<compile_context>
chip_gen: v7x
topology: tpu7x:2x2x1
jax: 0.10.0
libtpu: 0.0.40
codegen_flags: <defaults>
</compile_context>

<pallas_src>
import functools

import jax
import jax.numpy as jnp
from jax.experimental import pallas as pl
from jax.experimental.pallas import tpu as pltpu


def _make_kernel(heads, d, C, pos_emb, masked):
    """Builds the per-batch kernel. `pos_emb` / `masked` are static flags."""

    def kernel(*refs):
        x_cs_ref, x_sc_ref, wA_ref, bA_ref, wB_ref, bB_ref = refs[:6]
        idx = 6
        relT_ref = None
        mask_ref = None
        if pos_emb:
            relT_ref = refs[idx]
            idx += 1
        if masked:
            mask_ref = refs[idx]
            idx += 1
        o_ref = refs[idx]

        x_cs = x_cs_ref[0]                       # (C, Sp)  bf16
        x_sc = x_sc_ref[0]                       # (Sp, C)  bf16

        # ---- fused QKV projections: two big MXU matmuls per batch element ----
        # projA rows: [q (pos_emb only); k] channels, columns = pixels.
        projA = jnp.dot(wA_ref[...], x_cs,
                        preferred_element_type=jnp.float32) + bA_ref[...]
        # projB columns: [q^T | v^T] channels, rows = pixels.
        projB = jnp.dot(x_sc, wB_ref[...],
                        preferred_element_type=jnp.float32) + bB_ref[...]

        # ---- per-head attention (static unroll; heads is small) ----
        for h in range(heads):
            lo, hi = h * d, (h + 1) * d
            qT_h = projB[:, lo:hi].astype(jnp.bfloat16)            # (Sp, d)
            vT_h = projB[:, C + lo:C + hi].astype(jnp.bfloat16)    # (Sp, d)

            if pos_emb:
                q_h = projA[lo:hi, :].astype(jnp.bfloat16)         # (d, Sp)
                k_h = projA[C + lo:C + hi, :].astype(jnp.bfloat16)  # (d, Sp)
                relT_h = relT_ref[h]                               # (Sp, d) bf16
                # energy[s, t] = q[:,s].k[:,t] + rel[:,s].q[:,t]
                energy = jnp.dot(qT_h, k_h,
                                 preferred_element_type=jnp.float32)
                energy = energy + jnp.dot(relT_h, q_h,
                                          preferred_element_type=jnp.float32)
            else:
                k_h = projA[lo:hi, :].astype(jnp.bfloat16)         # (d, Sp)
                energy = jnp.dot(qT_h, k_h,
                                 preferred_element_type=jnp.float32)

            if masked:
                # -1e30 on padded key columns -> exp() == 0 after the max-shift.
                energy = energy + mask_ref[...]                    # (1, Sp)

            # numerically-stable softmax, normalization deferred past PV matmul
            m = jnp.max(energy, axis=-1, keepdims=True)            # (Sp, 1) f32
            p = jnp.exp(energy - m)                                # (Sp, Sp) f32
            l = jnp.sum(p, axis=-1, keepdims=True)                 # (Sp, 1) f32

            o_raw = jnp.dot(p.astype(jnp.bfloat16), vT_h,
                            preferred_element_type=jnp.float32)    # (Sp, d) f32
            o_h = o_raw * pl.reciprocal(l, approx=True)            # row rescale

            o_ref[0, :, lo:hi] = o_h.astype(o_ref.dtype)

    return kernel


def init_mhsa_params(key, n_dims, width, height, heads, pos_emb):
    """Deterministic synthetic parameters matching the torch module's shapes."""
    keys = jax.random.split(key, 8)
    s = 0.1
    params = {
        # Conv2d(n_dims, n_dims, kernel_size=1) -> weight (C, C), bias (C,)
        "wq": s * jax.random.normal(keys[0], (n_dims, n_dims), jnp.float32),
        "bq": s * jax.random.normal(keys[1], (n_dims,), jnp.float32),
        "wk": s * jax.random.normal(keys[2], (n_dims, n_dims), jnp.float32),
        "bk": s * jax.random.normal(keys[3], (n_dims,), jnp.float32),
        "wv": s * jax.random.normal(keys[4], (n_dims, n_dims), jnp.float32),
        "bv": s * jax.random.normal(keys[5], (n_dims,), jnp.float32),
    }
    if pos_emb:
        d = n_dims // heads
        params["rel_h"] = s * jax.random.normal(
            keys[6], (1, heads, d, 1, height), jnp.float32)
        params["rel_w"] = s * jax.random.normal(
            keys[7], (1, heads, d, width, 1), jnp.float32)
    return params


@functools.partial(jax.jit, static_argnames=("heads", "pos_emb"))
def mhsa_forward(x, params, *, heads, pos_emb):
    N, C, W, H = x.shape
    d = C // heads
    S = W * H
    Sp = max(128, ((S + 127) // 128) * 128)     # lane-dense padded seq length
    masked = Sp != S

    # ---- wrapper-side layout plumbing (free XLA ops, hoisted out of kernel) ----
    x_flat = x.reshape(N, C, S)
    if masked:
        x_flat = jnp.pad(x_flat, ((0, 0), (0, 0), (0, Sp - S)))
    x_cs = x_flat.astype(jnp.bfloat16)                            # (N, C, Sp)
    x_sc = jnp.transpose(x_flat, (0, 2, 1)).astype(jnp.bfloat16)  # (N, Sp, C)

    wq, wk, wv = params["wq"], params["wk"], params["wv"]
    bq, bk, bv = params["bq"], params["bk"], params["bv"]

    if pos_emb:
        wA = jnp.concatenate([wq, wk], axis=0).astype(jnp.bfloat16)   # (2C, C)
        bA = jnp.concatenate([bq, bk], axis=0).reshape(2 * C, 1)      # (2C, 1)
    else:
        wA = wk.astype(jnp.bfloat16)                                   # (C, C)
        bA = bk.reshape(C, 1)
    wB = jnp.concatenate([wq.T, wv.T], axis=1).astype(jnp.bfloat16)    # (C, 2C)
    bB = jnp.concatenate([bq, bv], axis=0).reshape(1, 2 * C)           # (1, 2C)

    inputs = [x_cs, x_sc, wA, bA, wB, bB]
    in_specs = [
        pl.BlockSpec((1, C, Sp), lambda n: (n, 0, 0)),
        pl.BlockSpec((1, Sp, C), lambda n: (n, 0, 0)),
        pl.BlockSpec(wA.shape, lambda n: (0, 0)),   # weights stay VMEM-resident
        pl.BlockSpec(bA.shape, lambda n: (0, 0)),
        pl.BlockSpec(wB.shape, lambda n: (0, 0)),
        pl.BlockSpec(bB.shape, lambda n: (0, 0)),
    ]

    if pos_emb:
        # (1,h,d,1,H)+(1,h,d,W,1) -> (h,d,S) -> pre-transposed (h,S,d) in bf16
        rel = (params["rel_h"] + params["rel_w"]).reshape(heads, d, S)
        relT = jnp.transpose(rel, (0, 2, 1))                       # (heads, S, d)
        if masked:
            relT = jnp.pad(relT, ((0, 0), (0, Sp - S), (0, 0)))
        relT = relT.astype(jnp.bfloat16)
        inputs.append(relT)
        in_specs.append(pl.BlockSpec((heads, Sp, d), lambda n: (0, 0, 0)))

    if masked:
        mask = jnp.where(jnp.arange(Sp) < S, 0.0, -1e30)
        mask = mask.astype(jnp.float32).reshape(1, Sp)
        inputs.append(mask)
        in_specs.append(pl.BlockSpec((1, Sp), lambda n: (0, 0)))

    out = pl.pallas_call(
        _make_kernel(heads, d, C, pos_emb, masked),
        out_shape=jax.ShapeDtypeStruct((N, Sp, C), jnp.float32),
        grid_spec=pltpu.PrefetchScalarGridSpec(
            num_scalar_prefetch=0,
            grid=(N,),
            in_specs=in_specs,
            out_specs=pl.BlockSpec((1, Sp, C), lambda n: (n, 0, 0)),
        ),
        compiler_params=pltpu.CompilerParams(
            dimension_semantics=("parallel",),
            vmem_limit_bytes=48 * 1024 * 1024,
        ),
    )(*inputs)

    # (N, Sp, C) -> (N, C, S) -> (N, C, W, H)   (matches torch .view semantics)
    out = jnp.transpose(out, (0, 2, 1))[:, :, :S]
    return out.reshape(N, C, W, H)


def mhsa_reference(x, params, *, heads, pos_emb):
    """Pure-JAX f32 reference mirroring the PyTorch forward exactly."""
    N, C, W, H = x.shape
    d = C // heads
    S = W * H
    xf = x.reshape(N, C, S)

    def proj(w, b):
        y = jnp.einsum("oc,ncs->nos", w, xf) + b[None, :, None]
        return y.reshape(N, heads, d, S)

    q = proj(params["wq"], params["bq"])
    k = proj(params["wk"], params["bk"])
    v = proj(params["wv"], params["bv"])

    cc = jnp.einsum("nhds,nhdt->nhst", q, k)                      # (N,h,S,S)
    if pos_emb:
        rel = (params["rel_h"] + params["rel_w"]).reshape(1, heads, d, S)
        cp = jnp.einsum("mhds,nhdt->nhst", rel, q)
        energy = cc + cp
    else:
        energy = cc
    attn = jax.nn.softmax(energy, axis=-1)
    out = jnp.einsum("nhdt,nhst->nhds", v, attn)                  # (N,h,d,S)
    return out.reshape(N, C, W, H)


if __name__ == "__main__":
    # Small but representative shapes: C divisible by heads, S = W*H = 64 < 128
    # so the padded/masked softmax path is exercised too.
    N, C, W, H, heads = 2, 32, 8, 8, 4

    key = jax.random.PRNGKey(0)
    k_x, k_p = jax.random.split(key)
    x = jax.random.normal(k_x, (N, C, W, H), jnp.float32)

    for pos_emb in (True, False):
        params = init_mhsa_params(k_p, C, W, H, heads, pos_emb)
        out = mhsa_forward(x, params, heads=heads, pos_emb=pos_emb)
        out = jax.block_until_ready(out)
        ref = mhsa_reference(x, params, heads=heads, pos_emb=pos_emb)
        assert out.shape == (N, C, W, H)
        # bf16 MXU inputs + approx reciprocal -> slightly looser tolerance.
        assert jnp.allclose(out, ref, atol=2e-2, rtol=2e-2), \
            f"mismatch vs reference (pos_emb={pos_emb})"

    print("KERNEL_OK")
</pallas_src>

<mosaic_0001>
module attributes {stable_mosaic.version = 11 : i64} {
  func.func @kernel(%arg0: i32, %arg1: memref<1x32x128xbf16, #tpu.memory_space<vmem>>, %arg2: memref<1x128x32xbf16, #tpu.memory_space<vmem>>, %arg3: memref<64x32xbf16, #tpu.memory_space<vmem>>, %arg4: memref<64x1xf32, #tpu.memory_space<vmem>>, %arg5: memref<32x64xbf16, #tpu.memory_space<vmem>>, %arg6: memref<1x64xf32, #tpu.memory_space<vmem>>, %arg7: memref<4x128x8xbf16, #tpu.memory_space<vmem>>, %arg8: memref<1x128xf32, #tpu.memory_space<vmem>>, %arg9: memref<1x128x32xf32, #tpu.memory_space<vmem>>) attributes {dimension_semantics = [#tpu.dimension_semantics<parallel>], iteration_bounds = array<i64: 2>, scalar_prefetch = 0 : i64, scratch_operands = 0 : i64, tpu.core_type = #tpu.core_type<tc>, window_params = [{transform_indices = @transform_0, window_bounds = array<i64: 1, 32, 128>}, {transform_indices = @transform_1, window_bounds = array<i64: 1, 128, 32>}, {pipeline_mode = #tpu.pipeline_mode<synchronous>, transform_indices = @transform_2, window_bounds = array<i64: 64, 32>}, {pipeline_mode = #tpu.pipeline_mode<synchronous>, transform_indices = @transform_3, window_bounds = array<i64: 64, 1>}, {pipeline_mode = #tpu.pipeline_mode<synchronous>, transform_indices = @transform_4, window_bounds = array<i64: 32, 64>}, {pipeline_mode = #tpu.pipeline_mode<synchronous>, transform_indices = @transform_5, window_bounds = array<i64: 1, 64>}, {pipeline_mode = #tpu.pipeline_mode<synchronous>, transform_indices = @transform_6, window_bounds = array<i64: 4, 128, 8>}, {pipeline_mode = #tpu.pipeline_mode<synchronous>, transform_indices = @transform_7, window_bounds = array<i64: 1, 128>}, {transform_indices = @transform_8, window_bounds = array<i64: 1, 128, 32>}]} {
    %c0 = arith.constant 0 : index
    %c0_0 = arith.constant 0 : index
    %c0_1 = arith.constant 0 : index
    %0 = vector.load %arg1[%c0, %c0_0, %c0_1] : memref<1x32x128xbf16, #tpu.memory_space<vmem>>, vector<1x32x128xbf16>
    %1 = vector.shape_cast %0 : vector<1x32x128xbf16> to vector<32x128xbf16>
    %c0_2 = arith.constant 0 : index
    %c0_3 = arith.constant 0 : index
    %c0_4 = arith.constant 0 : index
    %2 = vector.load %arg2[%c0_2, %c0_3, %c0_4] : memref<1x128x32xbf16, #tpu.memory_space<vmem>>, vector<1x128x32xbf16>
    %3 = vector.shape_cast %2 : vector<1x128x32xbf16> to vector<128x32xbf16>
    %c0_5 = arith.constant 0 : index
    %c0_6 = arith.constant 0 : index
    %4 = vector.load %arg3[%c0_5, %c0_6] : memref<64x32xbf16, #tpu.memory_space<vmem>>, vector<64x32xbf16>
    %cst = arith.constant dense<0.000000e+00> : vector<64x128xf32>
    %5 = tpu.matmul %4, %1, %cst {dimension_numbers = #tpu.dot_dimension_numbers<[1], [0], [0], [1], [0, 0, 1, 1], [], []>} : vector<64x32xbf16>, vector<32x128xbf16>, vector<64x128xf32> -> vector<64x128xf32>
    %c0_7 = arith.constant 0 : index
    %c0_8 = arith.constant 0 : index
    %6 = vector.load %arg4[%c0_7, %c0_8] : memref<64x1xf32, #tpu.memory_space<vmem>>, vector<64x1xf32>
    %7 = vector.broadcast %6 : vector<64x1xf32> to vector<64x128xf32>
    %8 = arith.addf %5, %7 : vector<64x128xf32>
    %c0_9 = arith.constant 0 : index
    %c0_10 = arith.constant 0 : index
    %9 = vector.load %arg5[%c0_9, %c0_10] : memref<32x64xbf16, #tpu.memory_space<vmem>>, vector<32x64xbf16>
    %cst_11 = arith.constant dense<0.000000e+00> : vector<128x64xf32>
    %10 = tpu.matmul %3, %9, %cst_11 {dimension_numbers = #tpu.dot_dimension_numbers<[1], [0], [0], [1], [0, 0, 1, 1], [], []>} : vector<128x32xbf16>, vector<32x64xbf16>, vector<128x64xf32> -> vector<128x64xf32>
    %c0_12 = arith.constant 0 : index
    %c0_13 = arith.constant 0 : index
    %11 = vector.load %arg6[%c0_12, %c0_13] : memref<1x64xf32, #tpu.memory_space<vmem>>, vector<1x64xf32>
    %12 = vector.broadcast %11 : vector<1x64xf32> to vector<128x64xf32>
    %13 = arith.addf %10, %12 : vector<128x64xf32>
    %14 = vector.extract_strided_slice %13 {offsets = [0, 0], sizes = [128, 8], strides = [1, 1]} : vector<128x64xf32> to vector<128x8xf32>
    %15 = arith.truncf %14 : vector<128x8xf32> to vector<128x8xbf16>
    %16 = vector.extract_strided_slice %13 {offsets = [0, 32], sizes = [128, 8], strides = [1, 1]} : vector<128x64xf32> to vector<128x8xf32>
    %17 = arith.truncf %16 : vector<128x8xf32> to vector<128x8xbf16>
    %18 = vector.extract_strided_slice %8 {offsets = [0, 0], sizes = [8, 128], strides = [1, 1]} : vector<64x128xf32> to vector<8x128xf32>
    %19 = arith.truncf %18 : vector<8x128xf32> to vector<8x128xbf16>
    %20 = vector.extract_strided_slice %8 {offsets = [32, 0], sizes = [8, 128], strides = [1, 1]} : vector<64x128xf32> to vector<8x128xf32>
    %21 = arith.truncf %20 : vector<8x128xf32> to vector<8x128xbf16>
    %c0_14 = arith.constant 0 : index
    %c0_15 = arith.constant 0 : index
    %c0_16 = arith.constant 0 : index
    %22 = vector.load %arg7[%c0_14, %c0_15, %c0_16] : memref<4x128x8xbf16, #tpu.memory_space<vmem>>, vector<1x128x8xbf16>
    %23 = vector.shape_cast %22 : vector<1x128x8xbf16> to vector<128x8xbf16>
    %cst_17 = arith.constant dense<0.000000e+00> : vector<128x128xf32>
    %24 = tpu.matmul %15, %21, %cst_17 {dimension_numbers = #tpu.dot_dimension_numbers<[1], [0], [0], [1], [0, 0, 1, 1], [], []>} : vector<128x8xbf16>, vector<8x128xbf16>, vector<128x128xf32> -> vector<128x128xf32>
    %cst_18 = arith.constant dense<0.000000e+00> : vector<128x128xf32>
    %25 = tpu.matmul %23, %19, %cst_18 {dimension_numbers = #tpu.dot_dimension_numbers<[1], [0], [0], [1], [0, 0, 1, 1], [], []>} : vector<128x8xbf16>, vector<8x128xbf16>, vector<128x128xf32> -> vector<128x128xf32>
    %26 = arith.addf %24, %25 : vector<128x128xf32>
    %c0_19 = arith.constant 0 : index
    %c0_20 = arith.constant 0 : index
    %27 = vector.load %arg8[%c0_19, %c0_20] : memref<1x128xf32, #tpu.memory_space<vmem>>, vector<1x128xf32>
    %28 = vector.broadcast %27 : vector<1x128xf32> to vector<128x128xf32>
    %29 = arith.addf %26, %28 : vector<128x128xf32>
    %cst_21 = arith.constant dense<0xFF800000> : vector<128xf32>
    %30 = vector.multi_reduction <maximumf>, %29, %cst_21 [1] : vector<128x128xf32> to vector<128xf32>
    %31 = vector.shape_cast %30 : vector<128xf32> to vector<128x1xf32>
    %32 = vector.broadcast %31 : vector<128x1xf32> to vector<128x128xf32>
    %33 = arith.subf %29, %32 : vector<128x128xf32>
    %34 = math.exp %33 : vector<128x128xf32>
    %cst_22 = arith.constant dense<0.000000e+00> : vector<128xf32>
    %35 = vector.multi_reduction <add>, %34, %cst_22 [1] : vector<128x128xf32> to vector<128xf32>
    %36 = vector.shape_cast %35 : vector<128xf32> to vector<128x1xf32>
    %37 = arith.truncf %34 : vector<128x128xf32> to vector<128x128xbf16>
    %cst_23 = arith.constant dense<0.000000e+00> : vector<128x8xf32>
    %38 = tpu.matmul %37, %17, %cst_23 {dimension_numbers = #tpu.dot_dimension_numbers<[1], [0], [0], [1], [0, 0, 1, 1], [], []>} : vector<128x128xbf16>, vector<128x8xbf16>, vector<128x8xf32> -> vector<128x8xf32>
    %39 = tpu.reciprocal %36 {approx = true} : vector<128x1xf32> -> vector<128x1xf32>
    %40 = vector.broadcast %39 : vector<128x1xf32> to vector<128x8xf32>
    %41 = arith.mulf %38, %40 : vector<128x8xf32>
    %c0_24 = arith.constant 0 : index
    %c0_25 = arith.constant 0 : index
    %c0_26 = arith.constant 0 : index
    %42 = vector.load %arg9[%c0_24, %c0_25, %c0_26] : memref<1x128x32xf32, #tpu.memory_space<vmem>>, vector<1x128x8xf32>
    %43 = vector.shape_cast %42 : vector<1x128x8xf32> to vector<128x8xf32>
    %44 = vector.shape_cast %41 : vector<128x8xf32> to vector<1x128x8xf32>
    tpu.vector_store %arg9[%c0_24, %c0_25, %c0_26], %44 {strides = array<i32>} : memref<1x128x32xf32, #tpu.memory_space<vmem>>, vector<1x128x8xf32>,
    %45 = vector.extract_strided_slice %13 {offsets = [0, 8], sizes = [128, 8], strides = [1, 1]} : vector<128x64xf32> to vector<128x8xf32>
    %46 = arith.truncf %45 : vector<128x8xf32> to vector<128x8xbf16>
    %47 = vector.extract_strided_slice %13 {offsets = [0, 40], sizes = [128, 8], strides = [1, 1]} : vector<128x64xf32> to vector<128x8xf32>
    %48 = arith.truncf %47 : vector<128x8xf32> to vector<128x8xbf16>
    %49 = vector.extract_strided_slice %8 {offsets = [8, 0], sizes = [8, 128], strides = [1, 1]} : vector<64x128xf32> to vector<8x128xf32>
    %50 = arith.truncf %49 : vector<8x128xf32> to vector<8x128xbf16>
    %51 = vector.extract_strided_slice %8 {offsets = [40, 0], sizes = [8, 128], strides = [1, 1]} : vector<64x128xf32> to vector<8x128xf32>
    %52 = arith.truncf %51 : vector<8x128xf32> to vector<8x128xbf16>
    %c1 = arith.constant 1 : index
    %c0_27 = arith.constant 0 : index
    %c0_28 = arith.constant 0 : index
    %53 = vector.load %arg7[%c1, %c0_27, %c0_28] : memref<4x128x8xbf16, #tpu.memory_space<vmem>>, vector<1x128x8xbf16>
    %54 = vector.shape_cast %53 : vector<1x128x8xbf16> to vector<128x8xbf16>
    %cst_29 = arith.constant dense<0.000000e+00> : vector<128x128xf32>
    %55 = tpu.matmul %46, %52, %cst_29 {dimension_numbers = #tpu.dot_dimension_numbers<[1], [0], [0], [1], [0, 0, 1, 1], [], []>} : vector<128x8xbf16>, vector<8x128xbf16>, vector<128x128xf32> -> vector<128x128xf32>
    %cst_30 = arith.constant dense<0.000000e+00> : vector<128x128xf32>
    %56 = tpu.matmul %54, %50, %cst_30 {dimension_numbers = #tpu.dot_dimension_numbers<[1], [0], [0], [1], [0, 0, 1, 1], [], []>} : vector<128x8xbf16>, vector<8x128xbf16>, vector<128x128xf32> -> vector<128x128xf32>
    %57 = arith.addf %55, %56 : vector<128x128xf32>
    %c0_31 = arith.constant 0 : index
    %c0_32 = arith.constant 0 : index
    %58 = vector.load %arg8[%c0_31, %c0_32] : memref<1x128xf32, #tpu.memory_space<vmem>>, vector<1x128xf32>
    %59 = vector.broadcast %58 : vector<1x128xf32> to vector<128x128xf32>
    %60 = arith.addf %57, %59 : vector<128x128xf32>
    %cst_33 = arith.constant dense<0xFF800000> : vector<128xf32>
    %61 = vector.multi_reduction <maximumf>, %60, %cst_33 [1] : vector<128x128xf32> to vector<128xf32>
    %62 = vector.shape_cast %61 : vector<128xf32> to vector<128x1xf32>
    %63 = vector.broadcast %62 : vector<128x1xf32> to vector<128x128xf32>
    %64 = arith.subf %60, %63 : vector<128x128xf32>
    %65 = math.exp %64 : vector<128x128xf32>
    %cst_34 = arith.constant dense<0.000000e+00> : vector<128xf32>
    %66 = vector.multi_reduction <add>, %65, %cst_34 [1] : vector<128x128xf32> to vector<128xf32>
    %67 = vector.shape_cast %66 : vector<128xf32> to vector<128x1xf32>
    %68 = arith.truncf %65 : vector<128x128xf32> to vector<128x128xbf16>
    %cst_35 = arith.constant dense<0.000000e+00> : vector<128x8xf32>
    %69 = tpu.matmul %68, %48, %cst_35 {dimension_numbers = #tpu.dot_dimension_numbers<[1], [0], [0], [1], [0, 0, 1, 1], [], []>} : vector<128x128xbf16>, vector<128x8xbf16>, vector<128x8xf32> -> vector<128x8xf32>
    %70 = tpu.reciprocal %67 {approx = true} : vector<128x1xf32> -> vector<128x1xf32>
    %71 = vector.broadcast %70 : vector<128x1xf32> to vector<128x8xf32>
    %72 = arith.mulf %69, %71 : vector<128x8xf32>
    %c0_36 = arith.constant 0 : index
    %c0_37 = arith.constant 0 : index
    %c8 = arith.constant 8 : index
    %73 = vector.load %arg9[%c0_36, %c0_37, %c8] : memref<1x128x32xf32, #tpu.memory_space<vmem>>, vector<1x128x8xf32>
    %74 = vector.shape_cast %73 : vector<1x128x8xf32> to vector<128x8xf32>
    %75 = vector.shape_cast %72 : vector<128x8xf32> to vector<1x128x8xf32>
    tpu.vector_store %arg9[%c0_36, %c0_37, %c8], %75 {strides = array<i32>} : memref<1x128x32xf32, #tpu.memory_space<vmem>>, vector<1x128x8xf32>,
    %76 = vector.extract_strided_slice %13 {offsets = [0, 16], sizes = [128, 8], strides = [1, 1]} : vector<128x64xf32> to vector<128x8xf32>
    %77 = arith.truncf %76 : vector<128x8xf32> to vector<128x8xbf16>
    %78 = vector.extract_strided_slice %13 {offsets = [0, 48], sizes = [128, 8], strides = [1, 1]} : vector<128x64xf32> to vector<128x8xf32>
    %79 = arith.truncf %78 : vector<128x8xf32> to vector<128x8xbf16>
    %80 = vector.extract_strided_slice %8 {offsets = [16, 0], sizes = [8, 128], strides = [1, 1]} : vector<64x128xf32> to vector<8x128xf32>
    %81 = arith.truncf %80 : vector<8x128xf32> to vector<8x128xbf16>
    %82 = vector.extract_strided_slice %8 {offsets = [48, 0], sizes = [8, 128], strides = [1, 1]} : vector<64x128xf32> to vector<8x128xf32>
    %83 = arith.truncf %82 : vector<8x128xf32> to vector<8x128xbf16>
    %c2 = arith.constant 2 : index
    %c0_38 = arith.constant 0 : index
    %c0_39 = arith.constant 0 : index
    %84 = vector.load %arg7[%c2, %c0_38, %c0_39] : memref<4x128x8xbf16, #tpu.memory_space<vmem>>, vector<1x128x8xbf16>
    %85 = vector.shape_cast %84 : vector<1x128x8xbf16> to vector<128x8xbf16>
    %cst_40 = arith.constant dense<0.000000e+00> : vector<128x128xf32>
    %86 = tpu.matmul %77, %83, %cst_40 {dimension_numbers = #tpu.dot_dimension_numbers<[1], [0], [0], [1], [0, 0, 1, 1], [], []>} : vector<128x8xbf16>, vector<8x128xbf16>, vector<128x128xf32> -> vector<128x128xf32>
    %cst_41 = arith.constant dense<0.000000e+00> : vector<128x128xf32>
    %87 = tpu.matmul %85, %81, %cst_41 {dimension_numbers = #tpu.dot_dimension_numbers<[1], [0], [0], [1], [0, 0, 1, 1], [], []>} : vector<128x8xbf16>, vector<8x128xbf16>, vector<128x128xf32> -> vector<128x128xf32>
    %88 = arith.addf %86, %87 : vector<128x128xf32>
    %c0_42 = arith.constant 0 : index
    %c0_43 = arith.constant 0 : index
    %89 = vector.load %arg8[%c0_42, %c0_43] : memref<1x128xf32, #tpu.memory_space<vmem>>, vector<1x128xf32>
    %90 = vector.broadcast %89 : vector<1x128xf32> to vector<128x128xf32>
    %91 = arith.addf %88, %90 : vector<128x128xf32>
    %cst_44 = arith.constant dense<0xFF800000> : vector<128xf32>
    %92 = vector.multi_reduction <maximumf>, %91, %cst_44 [1] : vector<128x128xf32> to vector<128xf32>
    %93 = vector.shape_cast %92 : vector<128xf32> to vector<128x1xf32>
    %94 = vector.broadcast %93 : vector<128x1xf32> to vector<128x128xf32>
    %95 = arith.subf %91, %94 : vector<128x128xf32>
    %96 = math.exp %95 : vector<128x128xf32>
    %cst_45 = arith.constant dense<0.000000e+00> : vector<128xf32>
    %97 = vector.multi_reduction <add>, %96, %cst_45 [1] : vector<128x128xf32> to vector<128xf32>
    %98 = vector.shape_cast %97 : vector<128xf32> to vector<128x1xf32>
    %99 = arith.truncf %96 : vector<128x128xf32> to vector<128x128xbf16>
    %cst_46 = arith.constant dense<0.000000e+00> : vector<128x8xf32>
    %100 = tpu.matmul %99, %79, %cst_46 {dimension_numbers = #tpu.dot_dimension_numbers<[1], [0], [0], [1], [0, 0, 1, 1], [], []>} : vector<128x128xbf16>, vector<128x8xbf16>, vector<128x8xf32> -> vector<128x8xf32>
    %101 = tpu.reciprocal %98 {approx = true} : vector<128x1xf32> -> vector<128x1xf32>
    %102 = vector.broadcast %101 : vector<128x1xf32> to vector<128x8xf32>
    %103 = arith.mulf %100, %102 : vector<128x8xf32>
    %c0_47 = arith.constant 0 : index
    %c0_48 = arith.constant 0 : index
    %c16 = arith.constant 16 : index
    %104 = vector.load %arg9[%c0_47, %c0_48, %c16] : memref<1x128x32xf32, #tpu.memory_space<vmem>>, vector<1x128x8xf32>
    %105 = vector.shape_cast %104 : vector<1x128x8xf32> to vector<128x8xf32>
    %106 = vector.shape_cast %103 : vector<128x8xf32> to vector<1x128x8xf32>
    tpu.vector_store %arg9[%c0_47, %c0_48, %c16], %106 {strides = array<i32>} : memref<1x128x32xf32, #tpu.memory_space<vmem>>, vector<1x128x8xf32>,
    %107 = vector.extract_strided_slice %13 {offsets = [0, 24], sizes = [128, 8], strides = [1, 1]} : vector<128x64xf32> to vector<128x8xf32>
    %108 = arith.truncf %107 : vector<128x8xf32> to vector<128x8xbf16>
    %109 = vector.extract_strided_slice %13 {offsets = [0, 56], sizes = [128, 8], strides = [1, 1]} : vector<128x64xf32> to vector<128x8xf32>
    %110 = arith.truncf %109 : vector<128x8xf32> to vector<128x8xbf16>
    %111 = vector.extract_strided_slice %8 {offsets = [24, 0], sizes = [8, 128], strides = [1, 1]} : vector<64x128xf32> to vector<8x128xf32>
    %112 = arith.truncf %111 : vector<8x128xf32> to vector<8x128xbf16>
    %113 = vector.extract_strided_slice %8 {offsets = [56, 0], sizes = [8, 128], strides = [1, 1]} : vector<64x128xf32> to vector<8x128xf32>
    %114 = arith.truncf %113 : vector<8x128xf32> to vector<8x128xbf16>
    %c3 = arith.constant 3 : index
    %c0_49 = arith.constant 0 : index
    %c0_50 = arith.constant 0 : index
    %115 = vector.load %arg7[%c3, %c0_49, %c0_50] : memref<4x128x8xbf16, #tpu.memory_space<vmem>>, vector<1x128x8xbf16>
    %116 = vector.shape_cast %115 : vector<1x128x8xbf16> to vector<128x8xbf16>
    %cst_51 = arith.constant dense<0.000000e+00> : vector<128x128xf32>
    %117 = tpu.matmul %108, %114, %cst_51 {dimension_numbers = #tpu.dot_dimension_numbers<[1], [0], [0], [1], [0, 0, 1, 1], [], []>} : vector<128x8xbf16>, vector<8x128xbf16>, vector<128x128xf32> -> vector<128x128xf32>
    %cst_52 = arith.constant dense<0.000000e+00> : vector<128x128xf32>
    %118 = tpu.matmul %116, %112, %cst_52 {dimension_numbers = #tpu.dot_dimension_numbers<[1], [0], [0], [1], [0, 0, 1, 1], [], []>} : vector<128x8xbf16>, vector<8x128xbf16>, vector<128x128xf32> -> vector<128x128xf32>
    %119 = arith.addf %117, %118 : vector<128x128xf32>
    %c0_53 = arith.constant 0 : index
    %c0_54 = arith.constant 0 : index
    %120 = vector.load %arg8[%c0_53, %c0_54] : memref<1x128xf32, #tpu.memory_space<vmem>>, vector<1x128xf32>
    %121 = vector.broadcast %120 : vector<1x128xf32> to vector<128x128xf32>
    %122 = arith.addf %119, %121 : vector<128x128xf32>
    %cst_55 = arith.constant dense<0xFF800000> : vector<128xf32>
    %123 = vector.multi_reduction <maximumf>, %122, %cst_55 [1] : vector<128x128xf32> to vector<128xf32>
    %124 = vector.shape_cast %123 : vector<128xf32> to vector<128x1xf32>
    %125 = vector.broadcast %124 : vector<128x1xf32> to vector<128x128xf32>
    %126 = arith.subf %122, %125 : vector<128x128xf32>
    %127 = math.exp %126 : vector<128x128xf32>
    %cst_56 = arith.constant dense<0.000000e+00> : vector<128xf32>
    %128 = vector.multi_reduction <add>, %127, %cst_56 [1] : vector<128x128xf32> to vector<128xf32>
    %129 = vector.shape_cast %128 : vector<128xf32> to vector<128x1xf32>
    %130 = arith.truncf %127 : vector<128x128xf32> to vector<128x128xbf16>
    %cst_57 = arith.constant dense<0.000000e+00> : vector<128x8xf32>
    %131 = tpu.matmul %130, %110, %cst_57 {dimension_numbers = #tpu.dot_dimension_numbers<[1], [0], [0], [1], [0, 0, 1, 1], [], []>} : vector<128x128xbf16>, vector<128x8xbf16>, vector<128x8xf32> -> vector<128x8xf32>
    %132 = tpu.reciprocal %129 {approx = true} : vector<128x1xf32> -> vector<128x1xf32>
    %133 = vector.broadcast %132 : vector<128x1xf32> to vector<128x8xf32>
    %134 = arith.mulf %131, %133 : vector<128x8xf32>
    %c0_58 = arith.constant 0 : index
    %c0_59 = arith.constant 0 : index
    %c24 = arith.constant 24 : index
    %135 = vector.load %arg9[%c0_58, %c0_59, %c24] : memref<1x128x32xf32, #tpu.memory_space<vmem>>, vector<1x128x8xf32>
    %136 = vector.shape_cast %135 : vector<1x128x8xf32> to vector<128x8xf32>
    %137 = vector.shape_cast %134 : vector<128x8xf32> to vector<1x128x8xf32>
    tpu.vector_store %arg9[%c0_58, %c0_59, %c24], %137 {strides = array<i32>} : memref<1x128x32xf32, #tpu.memory_space<vmem>>, vector<1x128x8xf32>,
    return
  }
  func.func @transform_0(%arg0: i32) -> (i32, i32, i32) {
    %c0_i32 = arith.constant 0 : i32
    %c0_i32_0 = arith.constant 0 : i32
    %c0_i32_1 = arith.constant 0 : i32
    return %arg0, %c0_i32, %c0_i32_0 : i32, i32, i32
  }
  func.func @transform_1(%arg0: i32) -> (i32, i32, i32) {
    %c0_i32 = arith.constant 0 : i32
    %c0_i32_0 = arith.constant 0 : i32
    %c0_i32_1 = arith.constant 0 : i32
    return %arg0, %c0_i32, %c0_i32_0 : i32, i32, i32
  }
  func.func @transform_2(%arg0: i32) -> (i32, i32) {
    %c0_i32 = arith.constant 0 : i32
    %c0_i32_0 = arith.constant 0 : i32
    %c0_i32_1 = arith.constant 0 : i32
    return %c0_i32, %c0_i32_0 : i32, i32
  }
  func.func @transform_3(%arg0: i32) -> (i32, i32) {
    %c0_i32 = arith.constant 0 : i32
    %c0_i32_0 = arith.constant 0 : i32
    %c0_i32_1 = arith.constant 0 : i32
    return %c0_i32, %c0_i32_0 : i32, i32
  }
  func.func @transform_4(%arg0: i32) -> (i32, i32) {
    %c0_i32 = arith.constant 0 : i32
    %c0_i32_0 = arith.constant 0 : i32
    %c0_i32_1 = arith.constant 0 : i32
    return %c0_i32, %c0_i32_0 : i32, i32
  }
  func.func @transform_5(%arg0: i32) -> (i32, i32) {
    %c0_i32 = arith.constant 0 : i32
    %c0_i32_0 = arith.constant 0 : i32
    %c0_i32_1 = arith.constant 0 : i32
    return %c0_i32, %c0_i32_0 : i32, i32
  }
  func.func @transform_6(%arg0: i32) -> (i32, i32, i32) {
    %c0_i32 = arith.constant 0 : i32
    %c0_i32_0 = arith.constant 0 : i32
    %c0_i32_1 = arith.constant 0 : i32
    %c0_i32_2 = arith.constant 0 : i32
    return %c0_i32, %c0_i32_0, %c0_i32_1 : i32, i32, i32
  }
  func.func @transform_7(%arg0: i32) -> (i32, i32) {
    %c0_i32 = arith.constant 0 : i32
    %c0_i32_0 = arith.constant 0 : i32
    %c0_i32_1 = arith.constant 0 : i32
    return %c0_i32, %c0_i32_0 : i32, i32
  }
  func.func @transform_8(%arg0: i32) -> (i32, i32, i32) {
    %c0_i32 = arith.constant 0 : i32
    %c0_i32_0 = arith.constant 0 : i32
    %c0_i32_1 = arith.constant 0 : i32
    return %arg0, %c0_i32, %c0_i32_0 : i32, i32, i32
  }
}

</mosaic_0001>

<bundles_post_ra>
// kernel: mhsa_forward.1
= control target key start
LH: loop header
LB: loop body
LE: loop exit
PB: predicated region body
PF: predicated region fallthrough
CT: control target
= control target key end

     0   :  { %s4611_s27 = smov 0   ;;  %s6015_s0 = inlined_call_operand.vmem [shape: bf16[2,32,128], index: 0, kind: input, shape index: {}]   ;;  %s6016_s1 = inlined_call_operand.vmem [shape: bf16[2,128,32], index: 1, kind: input, shape index: {}]   ;;  %s6017_s2 = inlined_call_operand.vmem [shape: bf16[64,32], index: 2, kind: input, shape index: {}]   ;;  %s6018_s3 = inlined_call_operand.vmem [shape: f32[64,1], index: 3, kind: input, shape index: {}]   ;;  %s6019_s4 = inlined_call_operand.vmem [shape: bf16[32,64], index: 4, kind: input, shape index: {}]   ;;  %s6020_s5 = inlined_call_operand.vmem [shape: f32[1,64], index: 5, kind: input, shape index: {}]   ;;  %s6021_s6 = inlined_call_operand.vmem [shape: bf16[4,128,8], index: 6, kind: input, shape index: {}]   ;;  %s6022_s7 = inlined_call_operand.vmem [shape: f32[1,128], index: 7, kind: input, shape index: {}]   ;;  %s6023_s8 = inlined_call_operand.vmem [shape: f32[2,128,32], index: 8, kind: output, shape index: {}]  }
   0x1 LB: > { %s3500_s28 = sadd.s32 4294967295, %s4553_s27   ;;  %p3504_p0 = scmp.ge.s32.totalorder %s4553_s27, 1  ;;  %s4553_s27 = sphi %s4611_s27, %s18_s27  }
   0x2   : > { %p272_p1 = scmp.lt.s32.totalorder %s4553_s27, 3 }
   0x4   : > { %p273_p2 = pnand %p3504_p0, %p272_p1 }
   0x6   : > { %276 = sbr.rel (%p273_p2) target bundleno = 2544 (0x9f0), region = 52 }
   0xd   : > { %p311_p3 = scmp.lt.s32.totalorder %s3500_s28, 1  ;;  %v4244_v0 = vld [vmem:[%s6017_s2] sm:$0xff]   ;;  %vm435_vm0 = vcmask 261120   ;;  %v4555_v1 = vmov 0   ;;  %v4249_v5 = vld [vmem:[%s6019_s4 + $0x8] sm:$0xff]   ;;  %v4246_v10 = vld [vmem:[%s6017_s2 + $0x10] sm:$0xff]  }
   0xe   : > { %3849 = vmatprep.mubr.msk.bf16.mxu0 %vm435_vm0, %v4244_v0  ;;  %4240 = vset.pattern.permute.xlu0 %v4555_v1  ;;  %v4248_v2 = vld [vmem:[%s6019_s4] sm:$0xff]   ;;  %v4245_v7 = vld [vmem:[%s6017_s2 + $0x8] sm:$0xff]   ;;  %v4247_v14 = vld [vmem:[%s6017_s2 + $0x18] sm:$0xff]   ;;  %vm763_vm1 = vcmask 64512   ;;  %vm788_vm2 = vcmask 1043456   ;;  %s4556_s17 = smov 96  }
   0xf   : > { %s6142_s28 = smov (!%p311_p3, %s3500_s28), 1  ;;  %4241 = vset.pattern.permute.xlu1 %v4555_v1  ;;  %3857 = vmatprep.subr.bf16.mxu1 %v4248_v2  ;;  %v355_v11 = vld [vmem:[%s6018_s3] sm:$0xff]  ;;  %v4259_v39 = vld [vmem:[%s6021_s6 + $0x8] sm:$0xff]   ;;  %v4260_v41 = vld [vmem:[%s6021_s6 + $0x10] sm:$0xff]   ;;  %s4557_s16 = smov 120   ;;  %vm2016_vm3 = vcmask 130112  }
  0x10   : > { %s3690_s9 = sshll.u32 %s6142_s28, 4  ;;  %s3691_s10 = sshll.u32 %s6142_s28, 6  ;;  %3858 = vmatpush3.bf16.msra.mxu1 %v4248_v2  ;;  %v359_v12 = vld [vmem:[%s6018_s3 + $0x20] sm:$0xff]  ;;  %365 = vperm.xlu0 %4240, %v355_v11   ;;  %v4261_v59 = vld [vmem:[%s6021_s6 + $0x18] sm:$0xff]   ;;  %vm2716_vm4 = vcmask 195712   ;;  %vm3416_vm5 = vcmask 261312  }
  0x11   : > { %s315_s13 = scalar_lea.vmem %s6015_s0, %s3690_s9  ;;  %s4636_s18 = scalar_lea.vmem %s6016_s1, %s3691_s10  ;;  %3859 = vmatprep.subr.bf16.mxu1 %v4249_v5  ;;  %v4258_v19 = vld [vmem:[%s6021_s6] sm:$0xff]  }
  0x12   : > { %v4242_v3 = vld [vmem:[%s315_s13] sm:$0xff]   ;;  %v4243_v4 = vld [vmem:[%s315_s13 + $0x8] sm:$0xff]   ;;  %v4252_v9 = vld [vmem:[%s4636_s18 + $0x10] sm:$0xff]   ;;  %s4559_s19 = smov 112   ;;  %s4561_s23 = smov 104  }
  0x13   : > { %3845 = vmatprep.subr.bf16.mxu0 %v4242_v3  ;;  %v4250_v6 = vld [vmem:[%s4636_s18] sm:$0xff]   ;;  %v4251_v8 = vld [vmem:[%s4636_s18 + $0x8] sm:$0xff]   ;;  %v4253_v13 = vld [vmem:[%s4636_s18 + $0x18] sm:$0xff]   ;;  %s3692_s24 = sshll.u32 %s6142_s28, 7  ;;  %s4565_s28 = smov 24  }
  0x14   : > { %3846 = vmatpush3.bf16.msra.mxu0 %v4242_v3  ;;  %3861 = vmatprep.mubr.msk.bf16.mxu1 %vm435_vm0, %v4250_v6  ;;  %v4254_v15 = vld [vmem:[%s4636_s18 + $0x20] sm:$0xff]   ;;  %v4255_v16 = vld [vmem:[%s4636_s18 + $0x28] sm:$0xff]   ;;  %v4256_v17 = vld [vmem:[%s4636_s18 + $0x30] sm:$0xff]   ;;  %s5773_s29 = scalar_lea.vmem %s6023_s8, %s3692_s24 }
  0x15   : > { %3847 = vmatprep.subr.bf16.mxu0 %v4243_v4  ;;  %3860 = vmatpush3.bf16.msra.mxu1 %v4249_v5  ;;  %v4257_v18 = vld [vmem:[%s4636_s18 + $0x38] sm:$0xff]   ;;  %v4682_v20 = vld [vmem:[%s6020_s5] ss:$0 sm:$0xff] }
  0x16   : > { %385 = vperm.xlu0 %4240, %v359_v12   ;;  %v4262_v60 = vld [vmem:[%s6021_s6 + $0x20] sm:$0xff]  }
  0x18   : > { %3848 = vmatpush3.bf16.msra.mxu0 %v4243_v4  ;;  %3862 = vmatmul.mubr.msk.bf16.vlgmr.msra.gmra.mrb[0].mxu1 %vm435_vm0, %v4251_v8  ;;  %v4264_v8 = vld [vmem:[%s6021_s6 + $0x30] sm:$0xff]  }
  0x19   : > { %3865 = vmatprep.mubr.msk.bf16.mxu1 %vm435_vm0, %v4252_v9 }
  0x1b   : > { %3850 = vmatmul.mubr.msk.bf16.vlgmr.msra.gmra.mrb[0].mxu0 %vm435_vm0, %v4245_v7  ;;  %v4263_v7 = vld [vmem:[%s6021_s6 + $0x28] sm:$0xff]  }
  0x1c   : > { %3853 = vmatprep.mubr.msk.bf16.mxu0 %vm435_vm0, %v4246_v10 }
  0x20   : > { %3866 = vmatmul.mubr.msk.bf16.gmra.mrb[4].mxu1 %vm435_vm0, %v4253_v13 }
  0x21   : > { %3869 = vmatprep.mubr.msk.bf16.mxu1 %vm435_vm0, %v4254_v15 }
  0x23   : > { %3854 = vmatmul.mubr.msk.bf16.gmra.mrb[4].mxu0 %vm435_vm0, %v4247_v14 }
  0x24   : > { %3879 = vmatprep.mubr.msk.bf16.mxu0 %vm763_vm1, %v4258_v19  ;;  %v4265_v19 = vld [vmem:[%s6021_s6 + $0x38] sm:$0xff]  }
  0x28   : > { %3870 = vmatmul.mubr.msk.bf16.gmra.mrb[8].mxu1 %vm435_vm0, %v4255_v16 }
  0x29   : > { %3873 = vmatprep.mubr.msk.bf16.mxu1 %vm435_vm0, %v4256_v17 }
  0x30   : > { %3874 = vmatmul.mubr.msk.bf16.gmra.mrb[12].mxu1 %vm435_vm0, %v4257_v18 }
  0x8f   : > { %v366_v21 = vpop.permute.xlu0 %365 }
  0x95   : > { %v386_v40 = vpop.permute.xlu0 %385 }
  0xeb   : > { %v3863_v22 = vpop.f32.mrb[0].mxu1 }
  0xec   : > { %v643_v24 = vadd.f32 %v3863_v22, %v4682_v20  ;;  %v634_v25 = vpop.f32.mrb[1].mxu1 }
  0xed   : > { %v635_v27 = vadd.f32 %v4682_v20, %v634_v25  ;;  %v3864_v28 = vpop.f32.mrb[2].mxu1 }
  0xee   : > { %v4684_v23 = vpop.f32.mrb[0].mxu0  ;;  %v646_v31 = vadd.f32 %v3864_v28, %v4682_v20  ;;  %v637_v32 = vpop.f32.mrb[3].mxu1 }
  0xef   : > { %v482_v26 = vpop.f32.mrb[1].mxu0  ;;  %v638_v34 = vadd.f32 %v4682_v20, %v637_v32 }
  0xf0   : > { %v483_v29 = vadd.f32 %v482_v26, %v366_v21  ;;  %v4688_v30 = vpop.f32.mrb[2].mxu0  ;;  %v4694_v36 = vpack.c.bf16 %v646_v31, %v643_v24 }
  0xf1   : > { %v4691_v33 = vpop.f32.mrb[3].mxu0  ;;  %v4696_v37 = vpack.c.bf16 %v638_v34, %v635_v27  ;;  %v4791_v27 = vld [vmem:[%s6022_s7] ss:$0 sm:$0xff] }
  0xf2   : > { %v705_v35 = vpack.c.bf16 %v483_v29, %v483_v29  ;;  %1166 = vrot.lane.b32.xlu1 %v4694_v36, %s4556_s17 }
  0xf3   : > { %v3867_v42 = vpop.f32.mrb[4].mxu1  ;;  %1164 = vrot.lane.b32.xlu0 %v4696_v37, %s4556_s17 }
  0xf4   : > { %v790_v38 = vsel %vm788_vm2, %v705_v35, 0  ;;  %4213 = vmatprep.subr.msk.bf16.mxu0 %vm788_vm2, %v705_v35  ;;  %v659_v44 = vadd.f32 %v3867_v42, %v4682_v20  ;;  %v650_v45 = vpop.f32.mrb[5].mxu1 }
  0xf5   : > { %3878 = vmatpush3.bf16.msra.mxu0 %v790_v38  ;;  %v651_v47 = vadd.f32 %v4682_v20, %v650_v45  ;;  %v3868_v48 = vpop.f32.mrb[6].mxu1 }
  0xf6   : > { %v4710_v43 = vpop.f32.mrb[4].mxu0  ;;  %v662_v51 = vadd.f32 %v3868_v48, %v4682_v20  ;;  %v653_v52 = vpop.f32.mrb[7].mxu1 }
  0xf7   : > { %v498_v46 = vpop.f32.mrb[5].mxu0  ;;  %v654_v54 = vadd.f32 %v4682_v20, %v653_v52 }
  0xf8   : > { %v499_v49 = vadd.f32 %v498_v46, %v386_v40  ;;  %3880 = vmatmul.mubr.msk.bf16.vlgmr.msra.gmra.mrb[8].mxu0 %vm763_vm1, %v4259_v39  ;;  %v4715_v50 = vpop.f32.mrb[6].mxu0  ;;  %v4722_v56 = vpack.c.bf16 %v662_v51, %v659_v44 }
  0xf9   : > { %v4718_v53 = vpop.f32.mrb[7].mxu0  ;;  %3883 = vmatprep.mubr.msk.bf16.mxu0 %vm763_vm1, %v4260_v41  ;;  %v4724_v57 = vpack.c.bf16 %v654_v54, %v651_v47 }
  0xfa   : > { %v706_v55 = vpack.c.bf16 %v499_v49, %v499_v49  ;;  %1170 = vrot.lane.b32.xlu1 %v4722_v56, %s4556_s17 }
  0xfb   : > { %v3871_v61 = vpop.f32.mrb[8].mxu1  ;;  %1168 = vrot.lane.b32.xlu0 %v4724_v57, %s4556_s17 }
  0xfc   : > { %v914_v58 = vsel %vm788_vm2, %v706_v55, 0  ;;  %4214 = vmatprep.subr.msk.bf16.mxu0 %vm788_vm2, %v706_v55  ;;  %v675_v62 = vadd.f32 %v3871_v61, %v4682_v20  ;;  %v666_v63 = vpop.f32.mrb[9].mxu1 }
  0xfd   : > { %3896 = vmatpush3.bf16.msra.mxu0 %v914_v58  ;;  %v667_v0 = vadd.f32 %v4682_v20, %v666_v63  ;;  %v3872_v1 = vpop.f32.mrb[10].mxu1 }
  0xfe   : > { %v678_v2 = vadd.f32 %v3872_v1, %v4682_v20  ;;  %v669_v3 = vpop.f32.mrb[11].mxu1 }
  0xff   : > { %v670_v4 = vadd.f32 %v4682_v20, %v669_v3  ;;  %v356_v3 = vld [vmem:[%s6018_s3 + $0x8] sm:$0xff] }
 0x100   : > { %3884 = vmatmul.mubr.msk.bf16.gmra.mrb[12].mxu0 %vm763_vm1, %v4261_v59  ;;  %v4744_v5 = vpack.c.bf16 %v678_v2, %v675_v62 }
 0x101   : > { %3887 = vmatprep.mubr.msk.bf16.mxu0 %vm763_vm1, %v4262_v60  ;;  %v4746_v6 = vpack.c.bf16 %v670_v4, %v667_v0  ;;  %v360_v4 = vld [vmem:[%s6018_s3 + $0x28] sm:$0xff] }
 0x102   : > { %1174 = vrot.lane.b32.xlu1 %v4744_v5, %s4556_s17 }
 0x103   : > { %1172 = vrot.lane.b32.xlu0 %v4746_v6, %s4556_s17  ;;  %v3875_v9 = vpop.f32.mrb[12].mxu1 }
 0x104   : > { %v691_v10 = vadd.f32 %v3875_v9, %v4682_v20  ;;  %v682_v11 = vpop.f32.mrb[13].mxu1 }
 0x105   : > { %v683_v12 = vadd.f32 %v4682_v20, %v682_v11  ;;  %v3876_v13 = vpop.f32.mrb[14].mxu1 }
 0x106   : > { %v694_v14 = vadd.f32 %v3876_v13, %v4682_v20  ;;  %v685_v15 = vpop.f32.mrb[15].mxu1 }
 0x107   : > { %v686_v16 = vadd.f32 %v4682_v20, %v685_v15 }
 0x108   : > { %3888 = vmatmul.mubr.msk.bf16.gmra.mrb[16].mxu0 %vm763_vm1, %v4263_v7  ;;  %v4764_v17 = vpack.c.bf16 %v694_v14, %v691_v10 }
 0x109   : > { %3891 = vmatprep.mubr.msk.bf16.mxu0 %vm763_vm1, %v4264_v8  ;;  %v4766_v18 = vpack.c.bf16 %v686_v16, %v683_v12 }
 0x110   : > { %3892 = vmatmul.mubr.msk.bf16.gmra.mrb[20].mxu0 %vm763_vm1, %v4265_v19 }
 0x111   : > { %3897 = vmatprep.mubr.msk.bf16.mxu0 %vm763_vm1, %v4696_v37 }
 0x118   : > { %3898 = vmatmul.mubr.msk.bf16.vlgmr.msra.gmra.mrb[8].mxu0 %vm763_vm1, %v4694_v36 }
 0x119   : > { %3901 = vmatprep.mubr.msk.bf16.mxu0 %vm763_vm1, %v4724_v57 }
 0x120   : > { %3902 = vmatmul.mubr.msk.bf16.gmra.mrb[12].mxu0 %vm763_vm1, %v4722_v56 }
 0x121   : > { %3905 = vmatprep.mubr.msk.bf16.mxu0 %vm763_vm1, %v4746_v6 }
 0x128   : > { %3906 = vmatmul.mubr.msk.bf16.gmra.mrb[16].mxu0 %vm763_vm1, %v4744_v5 }
 0x129   : > { %3909 = vmatprep.mubr.msk.bf16.mxu0 %vm763_vm1, %v4766_v18 }
 0x130   : > { %3910 = vmatmul.mubr.msk.bf16.gmra.mrb[20].mxu0 %vm763_vm1, %v4764_v17 }
 0x164   : > { %v1167_v21 = vpop.permute.xlu1 %1166 }
 0x165   : > { %v1165_v20 = vpop.permute.xlu0 %1164 }
 0x166   : > { %3913 = vmatprep.subr.bf16.mxu1 %v1165_v20 }
 0x167   : > { %3914 = vmatpush3.bf16.msra.mxu1 %v1165_v20 }
 0x168   : > { %3915 = vmatprep.subr.bf16.mxu1 %v1167_v21 }
 0x16b   : > { %3916 = vmatpush3.bf16.msra.mxu1 %v1167_v21 }
 0x16c   : > { %v1171_v24 = vpop.permute.xlu1 %1170 }
 0x16d   : > { %v1169_v22 = vpop.permute.xlu0 %1168 }
 0x16e   : > { %3917 = vmatprep.subr.bf16.mxu1 %v1169_v22 }
 0x16f   : > { %3918 = vmatpush3.bf16.msra.mxu1 %v1169_v22 }
 0x170   : > { %3919 = vmatprep.subr.bf16.mxu1 %v1171_v24 }
 0x173   : > { %3920 = vmatpush3.bf16.msra.mxu1 %v1171_v24 }
 0x174   : > { %v1175_v26 = vpop.permute.xlu1 %1174 }
 0x175   : > { %v1173_v25 = vpop.permute.xlu0 %1172 }
 0x176   : > { %3921 = vmatprep.subr.bf16.mxu1 %v1173_v25 }
 0x177   : > { %3922 = vmatpush3.bf16.msra.mxu1 %v1173_v25 }
 0x178   : > { %3923 = vmatprep.subr.bf16.mxu1 %v1175_v26 }
 0x17b   : > { %3924 = vmatpush3.bf16.msra.mxu1 %v1175_v26 }
 0x1eb   : > { %v3899_v28 = vpop.f32.mrb[8].mxu0 }
 0x1ec   : > { %v4794_v29 = vadd.f32 %v3899_v28, %v4791_v27  ;;  %v950_v31 = vpop.f32.mrb[9].mxu0 }
 0x1ed   : > { %v3900_v32 = vpop.f32.mrb[10].mxu0  ;;  %v4801_v38 = vadd.f32 %v4791_v27, %v950_v31 }
 0x1ee   : > { %v4797_v34 = vadd.f32 %v3900_v32, %v4791_v27  ;;  %1040 = vmax.xlane.f32.xlu1 %v4794_v29  ;;  %v953_v35 = vpop.f32.mrb[11].mxu0 }
 0x1ef   : > { %v4806_v40 = vadd.f32 %v4791_v27, %v953_v35 }
 0x1f0   : > { %1042 = vmax.xlane.f32.xlu0 %v4797_v34 }
 0x1f2   : > { %1036 = vmax.xlane.f32.xlu1 %v4801_v38 }
 0x1f3   : > { %v3903_v39 = vpop.f32.mrb[12].mxu0 }
 0x1f4   : > { %v966_v41 = vpop.f32.mrb[13].mxu0  ;;  %v4813_v46 = vadd.f32 %v3903_v39, %v4791_v27 }
 0x1f5   : > { %v3904_v42 = vpop.f32.mrb[14].mxu0  ;;  %v4821_v49 = vadd.f32 %v4791_v27, %v966_v41 }
 0x1f6   : > { %v4809_v44 = vadd.f32 %v3904_v42, %v4791_v27  ;;  %1038 = vmax.xlane.f32.xlu1 %v4806_v40  ;;  %v969_v45 = vpop.f32.mrb[15].mxu0 }
 0x1f7   : > { %v4817_v47 = vadd.f32 %v4791_v27, %v969_v45 }
 0x1f8   : > { %1050 = vmax.xlane.f32.xlu0 %v4809_v44 }
 0x1fa   : > { %1048 = vmax.xlane.f32.xlu1 %v4813_v46 }
 0x1fb   : > { %v3907_v48 = vpop.f32.mrb[16].mxu0 }
 0x1fc   : > { %1046 = vmax.xlane.f32.xlu0 %v4817_v47  ;;  %v982_v51 = vpop.f32.mrb[17].mxu0  ;;  %v4829_v58 = vadd.f32 %v3907_v48, %v4791_v27 }
 0x1fd   : > { %v3908_v52 = vpop.f32.mrb[18].mxu0  ;;  %v4837_v61 = vadd.f32 %v4791_v27, %v982_v51 }
 0x1fe   : > { %v4825_v54 = vadd.f32 %v3908_v52, %v4791_v27  ;;  %1044 = vmax.xlane.f32.xlu1 %v4821_v49  ;;  %v985_v55 = vpop.f32.mrb[19].mxu0 }
 0x1ff   : > { %v4833_v59 = vadd.f32 %v4791_v27, %v985_v55 }
 0x200   : > { %1058 = vmax.xlane.f32.xlu0 %v4825_v54 }
 0x202   : > { %1056 = vmax.xlane.f32.xlu1 %v4829_v58 }
 0x203   : > { %v3911_v60 = vpop.f32.mrb[20].mxu0 }
 0x204   : > { %1054 = vmax.xlane.f32.xlu0 %v4833_v59  ;;  %v998_v62 = vpop.f32.mrb[21].mxu0  ;;  %v4842_v1 = vadd.f32 %v3911_v60, %v4791_v27 }
 0x205   : > { %v3912_v63 = vpop.f32.mrb[22].mxu0  ;;  %v4846_v2 = vadd.f32 %v4791_v27, %v998_v62 }
 0x206   : > { %1052 = vmax.xlane.f32.xlu1 %v4837_v61  ;;  %v1001_v0 = vpop.f32.mrb[23].mxu0  ;;  %v4868_v8 = vadd.f32 %v3912_v63, %v4791_v27 }
 0x207   : > { %v4863_v7 = vadd.f32 %v4791_v27, %v1001_v0 }
 0x20a   : > { %1064 = vmax.xlane.f32.xlu1 %v4842_v1 }
 0x20e   : > { %1060 = vmax.xlane.f32.xlu1 %v4846_v2 }
 0x21a   : > { %1176 = vrot.lane.b32.xlu0 %v4766_v18, %s4556_s17 }
 0x21f   : > { %1178 = vrot.lane.b32.xlu1 %v4764_v17, %s4556_s17  ;;  %s4558_s17 = smov 88  }
 0x223   : > { %370 = vperm.xlu1 %4241, %v356_v3  }
 0x227   : > { %390 = vperm.xlu1 %4241, %v360_v4  }
 0x22b   : > { %1516 = vrot.lane.b32.xlu1 %v4696_v37, %s4557_s16 }
 0x22f   : > { %1518 = vrot.lane.b32.xlu1 %v4694_v36, %s4557_s16 }
 0x233   : > { %1522 = vrot.lane.b32.xlu1 %v4722_v56, %s4557_s16 }
 0x237   : > { %1524 = vrot.lane.b32.xlu1 %v4746_v6, %s4557_s16 }
 0x239   : > { %1062 = vmax.xlane.f32.xlu0 %v4863_v7 }
 0x23b   : > { %1526 = vrot.lane.b32.xlu1 %v4744_v5, %s4557_s16 }
 0x23d   : > { %1066 = vmax.xlane.f32.xlu0 %v4868_v8 }
 0x23f   : > { %1528 = vrot.lane.b32.xlu1 %v4766_v18, %s4557_s16 }
 0x243   : > { %1530 = vrot.lane.b32.xlu1 %v4764_v17, %s4557_s16 }
 0x247   : > { %1801 = vrot.lane.b32.xlu1 %v4694_v36, %s4558_s17 }
 0x24b   : > { %1805 = vrot.lane.b32.xlu1 %v4722_v56, %s4558_s17 }
 0x24f   : > { %1809 = vrot.lane.b32.xlu1 %v4744_v5, %s4558_s17 }
 0x253   : > { %1520 = vrot.lane.b32.xlu0 %v4724_v57, %s4557_s16 }
 0x257   : > { %1799 = vrot.lane.b32.xlu0 %v4696_v37, %s4558_s17 }
 0x25b   : > { %1803 = vrot.lane.b32.xlu0 %v4724_v57, %s4558_s17 }
 0x25f   : > { %1807 = vrot.lane.b32.xlu0 %v4746_v6, %s4558_s17 }
 0x27b   : > { %v1041_v9 = vpop.xlane.xlu1 %1040 }
 0x27c   : > { %v1070_v28 = vsub.f32 %v4794_v29, %v1041_v9 }
 0x27d   : > { %v1043_v12 = vpop.xlane.xlu0 %1042 }
 0x27e   : > { %v1071_v24 = vsub.f32 %v4797_v34, %v1043_v12  ;;  %v1088_v42 = vmul.f32 1.442695, %v1070_v28 }
 0x27f   : > { %v1037_v10 = vpop.xlane.xlu1 %1036 }
 0x280   : > { %v1068_v11 = vsub.f32 %v4801_v38, %v1037_v10  ;;  %v1090_v38 = vmul.f32 1.442695, %v1071_v24 }
 0x282   : > { %v1084_v13 = vmul.f32 1.442695, %v1068_v11 }
 0x283   : > { %v1039_v14 = vpop.xlane.xlu1 %1038 }
 0x284   : > { %v1069_v15 = vsub.f32 %v4806_v40, %v1039_v14  ;;  %4290 = vpow2.f32 %v1084_v13 }
 0x285   : > { %v1051_v16 = vpop.xlane.xlu0 %1050 }
 0x286   : > { %v1086_v19 = vmul.f32 1.442695, %v1069_v15  ;;  %v1075_v51 = vsub.f32 %v4809_v44, %v1051_v16 }
 0x287   : > { %v1049_v20 = vpop.xlane.xlu1 %1048 }
 0x288   : > { %4292 = vpow2.f32 %v1086_v19  ;;  %v1098_v63 = vmul.f32 1.442695, %v1075_v51 }
 0x289   : > { %v1047_v21 = vpop.xlane.xlu0 %1046  ;;  %4294 = vpow2.f32 %v1090_v38 }
 0x28a   : > { %v1073_v32 = vsub.f32 %v4817_v47, %v1047_v21 }
 0x28b   : > { %v1045_v22 = vpop.xlane.xlu1 %1044 }
 0x28c   : > { %v1072_v26 = vsub.f32 %v4821_v49, %v1045_v22  ;;  %v1094_v48 = vmul.f32 1.442695, %v1073_v32  ;;  %v1074_v49 = vsub.f32 %v4813_v46, %v1049_v20 }
 0x28d   : > { %v1059_v25 = vpop.xlane.xlu0 %1058 }
 0x28e   : > { %v4893_v35 = vpop.eup %4290  ;;  %v1092_v41 = vmul.f32 1.442695, %v1072_v26  ;;  %v1096_v60 = vmul.f32 1.442695, %v1074_v49  ;;  %v1079_v44 = vsub.f32 %v4825_v54, %v1059_v25 }
 0x28f   : > { %v1057_v31 = vpop.xlane.xlu1 %1056 }
 0x290   : > { %4296 = vpow2.f32 %v1092_v41  ;;  %v1078_v3 = vsub.f32 %v4829_v58, %v1057_v31  ;;  %v1106_v12 = vmul.f32 1.442695, %v1079_v44 }
 0x291   : > { %v1055_v39 = vpop.xlane.xlu0 %1054  ;;  %4298 = vpow2.f32 %v1088_v42 }
 0x292   : > { %v4895_v40 = vpop.eup %4292  ;;  %4300 = vpow2.f32 %v1094_v48  ;;  %v1077_v55 = vsub.f32 %v4833_v59, %v1055_v39  ;;  %v1104_v10 = vmul.f32 1.442695, %v1078_v3 }
 0x293   : > { %v1053_v45 = vpop.xlane.xlu1 %1052  ;;  %v1148_v34 = vpack.c.bf16 %v4895_v40, %v4893_v35  ;;  %4302 = vpow2.f32 %v1096_v60 }
 0x294   : > { %v1076_v47 = vsub.f32 %v4837_v61, %v1053_v45  ;;  %v1102_v46 = vmul.f32 1.442695, %v1077_v55  ;;  %v4906_v61 = vpop.eup %4294 }
 0x295   : > { %3929 = vmatprep.mubr.bf16.mxu1 %v1148_v34  ;;  %v1177_v29 = vpop.permute.xlu0 %1176 }
 0x296   : > { %3925 = vmatprep.subr.bf16.mxu1 %v1177_v29  ;;  %v1100_v62 = vmul.f32 1.442695, %v1076_v47 }
 0x297   : > { %3926 = vmatpush3.bf16.msra.mxu1 %v1177_v29  ;;  %v4902_v52 = vpop.xlane.xlu1 %1064 }
 0x298   : > { %4304 = vpow2.f32 %v1100_v62  ;;  %v1082_v48 = vsub.f32 %v4842_v1, %v4902_v52 }
 0x299   : > { %4306 = vpow2.f32 %v1098_v63 }
 0x29a   : > { %v4909_v9 = vpop.eup %4296  ;;  %4308 = vpow2.f32 %v1102_v46  ;;  %v1112_v60 = vmul.f32 1.442695, %v1082_v48 }
 0x29b   : > { %v1061_v0 = vpop.xlane.xlu1 %1060  ;;  %v4911_v59 = vpop.eup %4298  ;;  %4310 = vpow2.f32 %v1104_v10 }
 0x29c   : > { %v4913_v11 = vpop.eup %4300  ;;  %v1149_v58 = vpack.c.bf16 %v4906_v61, %v4911_v59  ;;  %4312 = vpow2.f32 %v1106_v12  ;;  %v1080_v45 = vsub.f32 %v4846_v2, %v1061_v0 }
 0x29d   : > { %v1150_v14 = vpack.c.bf16 %v4913_v11, %v4909_v9  ;;  %v4920_v16 = vpop.eup %4302 }
 0x29e   : > { %v1108_v49 = vmul.f32 1.442695, %v1080_v45 }
 0x29f   : > { %v1179_v4 = vpop.permute.xlu1 %1178 }
 0x2a0   : > { %3927 = vmatprep.subr.bf16.mxu1 %v1179_v4  ;;  %4314 = vpow2.f32 %v1108_v49 }
 0x2a1   : > { %3928 = vmatpush3.bf16.msra.mxu1 %v1179_v4 }
 0x2a2   : > { %v4922_v20 = vpop.eup %4304 }
 0x2a3   : > { %v371_v13 = vpop.permute.xlu1 %370  ;;  %v4927_v24 = vpop.eup %4306 }
 0x2a4   : > { %v486_v54 = vadd.f32 %v4691_v33, %v371_v13  ;;  %3930 = vmatmul.mubr.bf16.vlgmr.msra.gmra.mrb[16].mxu1 %v1149_v58  ;;  %v4929_v33 = vpop.eup %4308  ;;  %v1151_v26 = vpack.c.bf16 %v4927_v24, %v4920_v16  ;;  %v4266_v58 = vld [vmem:[%s6021_s6 + $0x40] sm:$0xff]  }
 0x2a5   : > { %3933 = vmatprep.mubr.bf16.mxu1 %v1150_v14  ;;  %v1152_v31 = vpack.c.bf16 %v4929_v33, %v4922_v20 }
 0x2a6   : > { %v1333_v15 = vpack.c.bf16 %v486_v54, %v486_v54  ;;  %v4267_v54 = vld [vmem:[%s6021_s6 + $0x48] sm:$0xff]  }
 0x2a7   : > { %v391_v19 = vpop.permute.xlu1 %390 }
 0x2a8   : > { %v502_v21 = vadd.f32 %v4718_v53, %v391_v19  ;;  %4215 = vmatprep.subr.msk.bf16.mxu1 %vm788_vm2, %v1333_v15  ;;  %v1417_v22 = vsel %vm788_vm2, %v1333_v15, 0  ;;  %v4938_v53 = vpop.eup %4310  ;;  %v4268_v15 = vld [vmem:[%s6021_s6 + $0x50] sm:$0xff]  }
 0x2a9   : > { %3946 = vmatpush3.bf16.msra.mxu1 %v1417_v22  ;;  %6031 = vst [vmem:[#allocation2_spill] sm:$0xff] %v4938_v53  ;;  %v4942_v38 = vpop.eup %4312  ;;  %v4269_v22 = vld [vmem:[%s6021_s6 + $0x58] sm:$0xff]  }
 0x2aa   : > { %v1334_v25 = vpack.c.bf16 %v502_v21, %v502_v21  ;;  %v1153_v39 = vpack.c.bf16 %v4942_v38, %v4938_v53  ;;  %v4957_v1 = vpop.eup %4314 }
 0x2ab   : > { %v4933_v28 = vpop.permute.xlu1 %1516  ;;  %6032 = vst [vmem:[#allocation3_spill] sm:$0xff] %v4957_v1 }
 0x2ac   : > { %3934 = vmatmul.mubr.bf16.gmra.mrb[20].mxu1 %v1151_v26  ;;  %4216 = vmatprep.subr.msk.bf16.mxu1 %vm788_vm2, %v1334_v25  ;;  %v1557_v21 = vsel %vm788_vm2, %v1334_v25, 0  ;;  %v4270_v26 = vld [vmem:[%s6021_s6 + $0x60] sm:$0xff]   ;;  %v4271_v25 = vld [vmem:[%s6021_s6 + $0x68] sm:$0xff]  }
 0x2ad   : > { %3937 = vmatprep.mubr.bf16.mxu1 %v1152_v31  ;;  %v4272_v31 = vld [vmem:[%s6021_s6 + $0x70] sm:$0xff]  }
 0x2af   : > { %v4940_v32 = vpop.permute.xlu1 %1518 }
 0x2b3   : > { %v4946_v41 = vpop.permute.xlu1 %1522 }
 0x2b4   : > { %3938 = vmatmul.mubr.bf16.gmra.mrb[24].mxu1 %v1153_v39  ;;  %v4273_v39 = vld [vmem:[%s6021_s6 + $0x78] sm:$0xff]  }
 0x2b7   : > { %v4948_v42 = vpop.permute.xlu1 %1524 }
 0x2bb   : > { %v4951_v34 = vpop.permute.xlu1 %1526 }
 0x2bf   : > { %v1529_v51 = vpop.permute.xlu1 %1528 }
 0x2c3   : > { %v1531_v2 = vpop.permute.xlu1 %1530 }
 0x2c6   : > { %v1063_v29 = vpop.xlane.xlu0 %1062 }
 0x2c7   : > { %v1081_v47 = vsub.f32 %v4863_v7, %v1063_v29  ;;  %v1802_v52 = vpop.permute.xlu1 %1801 }
 0x2c9   : > { %v1110_v55 = vmul.f32 1.442695, %v1081_v47 }
 0x2ca   : > { %v1067_v62 = vpop.xlane.xlu0 %1066 }
 0x2cb   : > { %4316 = vpow2.f32 %v1110_v55  ;;  %v1083_v63 = vsub.f32 %v4868_v8, %v1067_v62  ;;  %v1806_v13 = vpop.permute.xlu1 %1805 }
 0x2cc   : > { %4318 = vpow2.f32 %v1112_v60 }
 0x2cd   : > { %v1114_v46 = vmul.f32 1.442695, %v1083_v63 }
 0x2ce   : > { %v1521_v0 = vpop.permute.xlu0 %1520 }
 0x2cf   : > { %4320 = vpow2.f32 %v1114_v46  ;;  %v1810_v19 = vpop.permute.xlu1 %1809 }
 0x2d2   : > { %v1800_v3 = vpop.permute.xlu0 %1799 }
 0x2d3   : > { %3981 = vmatprep.subr.bf16.mxu0 %v1800_v3 }
 0x2d4   : > { %3982 = vmatpush3.bf16.msra.mxu0 %v1800_v3 }
 0x2d5   : > { %v4959_v7 = vpop.eup %4316  ;;  %3983 = vmatprep.subr.bf16.mxu0 %v1802_v52 }
 0x2d6   : > { %v1154_v44 = vpack.c.bf16 %v4959_v7, %v4957_v1  ;;  %v4963_v4 = vpop.eup %4318  ;;  %v1804_v8 = vpop.permute.xlu0 %1803 }
 0x2d7   : > { %6033 = vst [vmem:[#allocation4_spill] sm:$0xff] %v4963_v4 }
 0x2d8   : > { %3941 = vmatprep.mubr.bf16.mxu1 %v1154_v44  ;;  %3984 = vmatpush3.bf16.msra.mxu0 %v1802_v52 }
 0x2d9   : > { %v4965_v10 = vpop.eup %4320  ;;  %3985 = vmatprep.subr.bf16.mxu0 %v1804_v8 }
 0x2da   : > { %v1155_v12 = vpack.c.bf16 %v4965_v10, %v4963_v4  ;;  %v1808_v14 = vpop.permute.xlu0 %1807 }
 0x2dc   : > { %3942 = vmatmul.mubr.bf16.gmra.mrb[28].mxu1 %v1155_v12  ;;  %3986 = vmatpush3.bf16.msra.mxu0 %v1804_v8 }
 0x2dd   : > { %3987 = vmatprep.subr.bf16.mxu0 %v1806_v13  ;;  %3947 = vmatprep.mubr.msk.bf16.mxu1 %vm763_vm1, %v4266_v58 }
 0x2e0   : > { %3988 = vmatpush3.bf16.msra.mxu0 %v1806_v13 }
 0x2e1   : > { %3989 = vmatprep.subr.bf16.mxu0 %v1808_v14 }
 0x2e4   : > { %3948 = vmatmul.mubr.msk.bf16.vlgmr.msra.gmra.mrb[32].mxu1 %vm763_vm1, %v4267_v54  ;;  %3990 = vmatpush3.bf16.msra.mxu0 %v1808_v14 }
 0x2e5   : > { %3964 = vmatpush3.bf16.msra.mxu1 %v1557_v21  ;;  %3991 = vmatprep.subr.bf16.mxu0 %v1810_v19 }
 0x2e6   : > { %3951 = vmatprep.mubr.msk.bf16.mxu1 %vm763_vm1, %v4268_v15 }
 0x2e8   : > { %3992 = vmatpush3.bf16.msra.mxu0 %v1810_v19 }
 0x2ec   : > { %3952 = vmatmul.mubr.msk.bf16.gmra.mrb[36].mxu1 %vm763_vm1, %v4269_v22 }
 0x2ed   : > { %3955 = vmatprep.mubr.msk.bf16.mxu1 %vm763_vm1, %v4270_v26 }
 0x2f4   : > { %3956 = vmatmul.mubr.msk.bf16.gmra.mrb[40].mxu1 %vm763_vm1, %v4271_v25 }
 0x2f5   : > { %3959 = vmatprep.mubr.msk.bf16.mxu1 %vm763_vm1, %v4272_v31 }
 0x2fc   : > { %3960 = vmatmul.mubr.msk.bf16.gmra.mrb[44].mxu1 %vm763_vm1, %v4273_v39 }
 0x2fd   : > { %3965 = vmatprep.mubr.msk.bf16.mxu1 %vm763_vm1, %v4933_v28 }
 0x304   : > { %3966 = vmatmul.mubr.msk.bf16.vlgmr.msra.gmra.mrb[32].mxu1 %vm763_vm1, %v4940_v32 }
 0x305   : > { %3969 = vmatprep.mubr.msk.bf16.mxu1 %vm763_vm1, %v1521_v0 }
 0x30c   : > { %3970 = vmatmul.mubr.msk.bf16.gmra.mrb[36].mxu1 %vm763_vm1, %v4946_v41 }
 0x30d   : > { %3973 = vmatprep.mubr.msk.bf16.mxu1 %vm763_vm1, %v4948_v42 }
 0x314   : > { %3974 = vmatmul.mubr.msk.bf16.gmra.mrb[40].mxu1 %vm763_vm1, %v4951_v34 }
 0x315   : > { %3977 = vmatprep.mubr.msk.bf16.mxu1 %vm763_vm1, %v1529_v51 }
 0x31c   : > { %3978 = vmatmul.mubr.msk.bf16.gmra.mrb[44].mxu1 %vm763_vm1, %v1531_v2 }
 0x377   : > { %v5015_v45 = vpop.f32.mrb[16].mxu1 }
 0x378   : > { %6034 = vst [vmem:[#allocation5_spill] sm:$0xff] %v5015_v45  ;;  %v5017_v28 = vpop.f32.mrb[17].mxu1 }
 0x379   : > { %6035 = vst [vmem:[#allocation6_spill] sm:$0xff] %v5017_v28  ;;  %v5019_v32 = vpop.f32.mrb[18].mxu1 }
 0x37a   : > { %6036 = vst [vmem:[#allocation7_spill] sm:$0xff] %v5019_v32  ;;  %v5021_v48 = vpop.f32.mrb[19].mxu1 }
 0x37b   : > { %6037 = vst [vmem:[#allocation8_spill] sm:$0xff] %v5021_v48 }
 0x37f   : > { %v5023_v49 = vpop.f32.mrb[20].mxu1 }
 0x380   : > { %6038 = vst [vmem:[#allocation9_spill] sm:$0xff] %v5023_v49  ;;  %v5025_v41 = vpop.f32.mrb[21].mxu1 }
 0x381   : > { %6039 = vst [vmem:[#allocation10_spill] sm:$0xff] %v5025_v41  ;;  %v5027_v42 = vpop.f32.mrb[22].mxu1 }
 0x382   : > { %6040 = vst [vmem:[#allocation11_spill] sm:$0xff] %v5027_v42  ;;  %v5029_v29 = vpop.f32.mrb[23].mxu1 }
 0x383   : > { %6041 = vst [vmem:[#allocation12_spill] sm:$0xff] %v5029_v29 }
 0x387   : > { %v5031_v34 = vpop.f32.mrb[24].mxu1 }
 0x388   : > { %6042 = vst [vmem:[#allocation13_spill] sm:$0xff] %v5031_v34  ;;  %v5033_v47 = vpop.f32.mrb[25].mxu1 }
 0x389   : > { %6043 = vst [vmem:[#allocation14_spill] sm:$0xff] %v5033_v47  ;;  %v5035_v51 = vpop.f32.mrb[26].mxu1 }
 0x38a   : > { %6044 = vst [vmem:[#allocation15_spill] sm:$0xff] %v5035_v51  ;;  %v5037_v55 = vpop.f32.mrb[27].mxu1 }
 0x38b   : > { %6045 = vst [vmem:[#allocation16_spill] sm:$0xff] %v5037_v55 }
 0x3af   : > { %v5039_v60 = vpop.f32.mrb[28].mxu1 }
 0x3b0   : > { %6046 = vst [vmem:[#allocation17_spill] sm:$0xff] %v5039_v60  ;;  %v5041_v62 = vpop.f32.mrb[29].mxu1 }
 0x3b1   : > { %6047 = vst [vmem:[#allocation18_spill] sm:$0xff] %v5041_v62  ;;  %v5043_v63 = vpop.f32.mrb[30].mxu1 }
 0x3b2   : > { %6048 = vst [vmem:[#allocation19_spill] sm:$0xff] %v5043_v63  ;;  %v5045_v46 = vpop.f32.mrb[31].mxu1 }
 0x3b3   : > { %6049 = vst [vmem:[#allocation20_spill] sm:$0xff] %v5045_v46 }
 0x3d7   : > { %v3967_v2 = vpop.f32.mrb[32].mxu1 }
 0x3d8   : > { %v5048_v0 = vadd.f32 %v3967_v2, %v4791_v27  ;;  %v1593_v3 = vpop.f32.mrb[33].mxu1 }
 0x3d9   : > { %v5051_v52 = vadd.f32 %v4791_v27, %v1593_v3  ;;  %v3968_v44 = vpop.f32.mrb[34].mxu1 }
 0x3da   : > { %1683 = vmax.xlane.f32.xlu1 %v5048_v0  ;;  %v1596_v8 = vpop.f32.mrb[35].mxu1  ;;  %v5056_v58 = vadd.f32 %v3968_v44, %v4791_v27 }
 0x3db   : > { %1679 = vmax.xlane.f32.xlu0 %v5051_v52  ;;  %v5060_v13 = vadd.f32 %v4791_v27, %v1596_v8 }
 0x3de   : > { %1685 = vmax.xlane.f32.xlu1 %v5056_v58 }
 0x3df   : > { %v3971_v12 = vpop.f32.mrb[36].mxu1 }
 0x3e0   : > { %v1609_v14 = vpop.f32.mrb[37].mxu1  ;;  %v5068_v21 = vadd.f32 %v3971_v12, %v4791_v27 }
 0x3e1   : > { %v5063_v54 = vadd.f32 %v4791_v27, %v1609_v14  ;;  %v3972_v15 = vpop.f32.mrb[38].mxu1 }
 0x3e2   : > { %1681 = vmax.xlane.f32.xlu1 %v5060_v13  ;;  %v1612_v19 = vpop.f32.mrb[39].mxu1  ;;  %v5072_v26 = vadd.f32 %v3972_v15, %v4791_v27 }
 0x3e3   : > { %1687 = vmax.xlane.f32.xlu0 %v5063_v54  ;;  %v5076_v2 = vadd.f32 %v4791_v27, %v1612_v19 }
 0x3e6   : > { %1691 = vmax.xlane.f32.xlu1 %v5068_v21 }
 0x3e7   : > { %v3975_v22 = vpop.f32.mrb[40].mxu1 }
 0x3e8   : > { %v1625_v25 = vpop.f32.mrb[41].mxu1  ;;  %v5080_v44 = vadd.f32 %v3975_v22, %v4791_v27  ;;  %v357_v22 = vld [vmem:[%s6018_s3 + $0x10] sm:$0xff] }
 0x3e9   : > { %v3976_v31 = vpop.f32.mrb[42].mxu1 }
 0x3ea   : > { %1693 = vmax.xlane.f32.xlu1 %v5072_v26  ;;  %v1628_v39 = vpop.f32.mrb[43].mxu1 }
 0x3eb   : > { %v5084_v15 = vadd.f32 %v4791_v27, %v1628_v39  ;;  %v361_v39 = vld [vmem:[%s6018_s3 + $0x30] sm:$0xff] }
 0x3ee   : > { %1689 = vmax.xlane.f32.xlu1 %v5076_v2 }
 0x3ef   : > { %v3979_v3 = vpop.f32.mrb[44].mxu1 }
 0x3f0   : > { %v1641_v8 = vpop.f32.mrb[45].mxu1  ;;  %v5088_v60 = vadd.f32 %v3979_v3, %v4791_v27  ;;  %v5106_v3 = vadd.f32 %v4791_v27, %v1625_v25 }
 0x3f1   : > { %v3980_v12 = vpop.f32.mrb[46].mxu1  ;;  %v5094_v19 = vadd.f32 %v4791_v27, %v1641_v8  ;;  %v5110_v8 = vadd.f32 %v3976_v31, %v4791_v27 }
 0x3f2   : > { %1699 = vmax.xlane.f32.xlu1 %v5080_v44  ;;  %v1644_v14 = vpop.f32.mrb[47].mxu1  ;;  %v5120_v25 = vadd.f32 %v3980_v12, %v4791_v27 }
 0x3f6   : > { %1697 = vmax.xlane.f32.xlu1 %v5084_v15 }
 0x3f9   : > { %1811 = vrot.lane.b32.xlu0 %v4766_v18, %s4558_s17 }
 0x3fa   : > { %1707 = vmax.xlane.f32.xlu1 %v5088_v60 }
 0x3fe   : > { %1703 = vmax.xlane.f32.xlu1 %v5094_v19 }
 0x40f   : > { %1813 = vrot.lane.b32.xlu1 %v4764_v17, %s4558_s17  ;;  %s4560_s17 = smov 80  }
 0x413   : > { %375 = vperm.xlu1 %4241, %v357_v22   ;;  %v5115_v22 = vadd.f32 %v4791_v27, %v1644_v14 }
 0x417   : > { %395 = vperm.xlu1 %4241, %v361_v39  }
 0x418   : > { %1695 = vmax.xlane.f32.xlu0 %v5106_v3 }
 0x41b   : > { %2216 = vrot.lane.b32.xlu1 %v4696_v37, %s4559_s19 }
 0x41c   : > { %1701 = vmax.xlane.f32.xlu0 %v5110_v8 }
 0x41f   : > { %2220 = vrot.lane.b32.xlu1 %v4724_v57, %s4559_s19 }
 0x420   : > { %1705 = vmax.xlane.f32.xlu0 %v5115_v22 }
 0x423   : > { %2222 = vrot.lane.b32.xlu1 %v4722_v56, %s4559_s19 }
 0x424   : > { %1709 = vmax.xlane.f32.xlu0 %v5120_v25 }
 0x427   : > { %2224 = vrot.lane.b32.xlu1 %v4746_v6, %s4559_s19 }
 0x42b   : > { %2226 = vrot.lane.b32.xlu1 %v4744_v5, %s4559_s19 }
 0x42f   : > { %2228 = vrot.lane.b32.xlu1 %v4766_v18, %s4559_s19 }
 0x433   : > { %2230 = vrot.lane.b32.xlu1 %v4764_v17, %s4559_s19 }
 0x437   : > { %2501 = vrot.lane.b32.xlu1 %v4694_v36, %s4560_s17 }
 0x43a   : > { %2218 = vrot.lane.b32.xlu0 %v4694_v36, %s4559_s19 }
 0x43b   : > { %2507 = vrot.lane.b32.xlu1 %v4746_v6, %s4560_s17 }
 0x43e   : > { %2499 = vrot.lane.b32.xlu0 %v4696_v37, %s4560_s17 }
 0x43f   : > { %2511 = vrot.lane.b32.xlu1 %v4766_v18, %s4560_s17 }
 0x442   : > { %2503 = vrot.lane.b32.xlu0 %v4724_v57, %s4560_s17 }
 0x446   : > { %2505 = vrot.lane.b32.xlu0 %v4722_v56, %s4560_s17 }
 0x44a   : > { %2509 = vrot.lane.b32.xlu0 %v4744_v5, %s4560_s17 }
 0x467   : > { %v1684_v31 = vpop.xlane.xlu1 %1683 }
 0x468   : > { %v1680_v12 = vpop.xlane.xlu0 %1679 }
 0x469   : > { %v1711_v14 = vsub.f32 %v5051_v52, %v1680_v12 }
 0x46b   : > { %v1686_v39 = vpop.xlane.xlu1 %1685  ;;  %v1727_v62 = vmul.f32 1.442695, %v1711_v14 }
 0x46c   : > { %v1714_v42 = vsub.f32 %v5056_v58, %v1686_v39 }
 0x46d   : > { %4322 = vpow2.f32 %v1727_v62 }
 0x46f   : > { %v1682_v34 = vpop.xlane.xlu1 %1681 }
 0x470   : > { %v1712_v63 = vsub.f32 %v5060_v13, %v1682_v34  ;;  %v1688_v47 = vpop.xlane.xlu0 %1687  ;;  %v1713_v34 = vsub.f32 %v5048_v0, %v1684_v31 }
 0x472   : > { %v1729_v46 = vmul.f32 1.442695, %v1712_v63  ;;  %v1715_v63 = vsub.f32 %v5063_v54, %v1688_v47  ;;  %v1731_v14 = vmul.f32 1.442695, %v1713_v34 }
 0x473   : > { %v1692_v49 = vpop.xlane.xlu1 %1691 }
 0x474   : > { %4324 = vpow2.f32 %v1729_v46  ;;  %v1812_v51 = vpop.permute.xlu0 %1811  ;;  %v1733_v46 = vmul.f32 1.442695, %v1714_v42  ;;  %v1735_v29 = vmul.f32 1.442695, %v1715_v63 }
 0x475   : > { %3993 = vmatprep.subr.bf16.mxu0 %v1812_v51 }
 0x476   : > { %3994 = vmatpush3.bf16.msra.mxu0 %v1812_v51  ;;  %4326 = vpow2.f32 %v1733_v46 }
 0x477   : > { %v1694_v41 = vpop.xlane.xlu1 %1693  ;;  %v5145_v45 = vpop.eup %4322 }
 0x478   : > { %v1718_v58 = vsub.f32 %v5072_v26, %v1694_v41 }
 0x47b   : > { %v1690_v55 = vpop.xlane.xlu1 %1689 }
 0x47c   : > { %v1716_v12 = vsub.f32 %v5076_v2, %v1690_v55  ;;  %v1717_v55 = vsub.f32 %v5068_v21, %v1692_v49  ;;  %v1741_v2 = vmul.f32 1.442695, %v1718_v58 }
 0x47e   : > { %v5148_v52 = vpop.eup %4324  ;;  %v1737_v51 = vmul.f32 1.442695, %v1716_v12  ;;  %v1739_v31 = vmul.f32 1.442695, %v1717_v55 }
 0x47f   : > { %v1700_v13 = vpop.xlane.xlu1 %1699  ;;  %v1791_v62 = vpack.c.bf16 %v5148_v52, %v5145_v45 }
 0x480   : > { %4328 = vpow2.f32 %v1737_v51  ;;  %v5157_v47 = vpop.eup %4326 }
 0x481   : > { %3997 = vmatprep.mubr.bf16.mxu0 %v1791_v62  ;;  %4330 = vpow2.f32 %v1731_v14 }
 0x482   : > { %4332 = vpow2.f32 %v1735_v29 }
 0x483   : > { %v1698_v28 = vpop.xlane.xlu1 %1697  ;;  %4334 = vpow2.f32 %v1741_v2 }
 0x484   : > { %4336 = vpow2.f32 %v1739_v31 }
 0x487   : > { %v1708_v0 = vpop.xlane.xlu1 %1707 }
 0x48a   : > { %v5159_v54 = vpop.eup %4328 }
 0x48b   : > { %v1704_v39 = vpop.xlane.xlu1 %1703  ;;  %v5161_v12 = vpop.eup %4330 }
 0x48c   : > { %v5163_v41 = vpop.eup %4332  ;;  %v1792_v49 = vpack.c.bf16 %v5157_v47, %v5161_v12 }
 0x48d   : > { %v1793_v21 = vpack.c.bf16 %v5159_v54, %v5163_v41  ;;  %v5170_v62 = vpop.eup %4334 }
 0x48e   : > { %v5175_v14 = vpop.eup %4336 }
 0x48f   : > { %v1814_v42 = vpop.permute.xlu1 %1813 }
 0x490   : > { %3995 = vmatprep.subr.bf16.mxu0 %v1814_v42 }
 0x491   : > { %3996 = vmatpush3.bf16.msra.mxu0 %v1814_v42  ;;  %v1721_v42 = vsub.f32 %v5080_v44, %v1700_v13  ;;  %v1725_v44 = vsub.f32 %v5088_v60, %v1708_v0 }
 0x493   : > { %v376_v29 = vpop.permute.xlu1 %375 }
 0x494   : > { %v491_v26 = vadd.f32 %v4684_v23, %v376_v29  ;;  %3998 = vmatmul.mubr.bf16.vlgmr.msra.gmra.mrb[24].mxu0 %v1792_v49  ;;  %v1794_v23 = vpack.c.bf16 %v5170_v62, %v5175_v14 }
 0x495   : > { %4001 = vmatprep.mubr.bf16.mxu0 %v1793_v21 }
 0x496   : > { %v2033_v34 = vpack.c.bf16 %v491_v26, %v491_v26 }
 0x497   : > { %v396_v63 = vpop.permute.xlu1 %395 }
 0x498   : > { %v507_v46 = vadd.f32 %v4710_v43, %v396_v63  ;;  %4217 = vmatprep.subr.msk.bf16.mxu0 %vm788_vm2, %v2033_v34  ;;  %v2117_v51 = vsel %vm788_vm2, %v2033_v34, 0  ;;  %v1720_v43 = vsub.f32 %v5084_v15, %v1698_v28  ;;  %v1747_v63 = vmul.f32 1.442695, %v1721_v42 }
 0x499   : > { %4014 = vmatpush3.bf16.msra.mxu0 %v2117_v51 }
 0x49a   : > { %v5177_v58 = vpack.c.bf16 %v507_v46, %v507_v46  ;;  %v1745_v49 = vmul.f32 1.442695, %v1720_v43  ;;  %v1723_v46 = vsub.f32 %v5094_v19, %v1704_v39 }
 0x49b   : > { %v5181_v55 = vpop.permute.xlu1 %2216 }
 0x49c   : > { %4002 = vmatmul.mubr.bf16.gmra.mrb[28].mxu0 %v1794_v23  ;;  %4218 = vmatprep.subr.msk.bf16.mxu0 %vm788_vm2, %v5177_v58  ;;  %4338 = vpow2.f32 %v1745_v49  ;;  %v1751_v13 = vmul.f32 1.442695, %v1723_v46  ;;  %v1755_v49 = vmul.f32 1.442695, %v1725_v44 }
 0x49f   : > { %v5185_v2 = vpop.permute.xlu1 %2220 }
 0x4a3   : > { %v5188_v31 = vpop.permute.xlu1 %2222 }
 0x4a5   : > { %v1696_v29 = vpop.xlane.xlu0 %1695 }
 0x4a6   : > { %v1719_v21 = vsub.f32 %v5106_v3, %v1696_v29  ;;  %v5203_v39 = vpop.eup %4338 }
 0x4a7   : > { %v5192_v26 = vpop.permute.xlu1 %2224 }
 0x4a8   : > { %v1743_v34 = vmul.f32 1.442695, %v1719_v21 }
 0x4a9   : > { %v1702_v51 = vpop.xlane.xlu0 %1701 }
 0x4aa   : > { %4340 = vpow2.f32 %v1743_v34  ;;  %v1722_v23 = vsub.f32 %v5110_v8, %v1702_v51 }
 0x4ab   : > { %v5196_v28 = vpop.permute.xlu1 %2226  ;;  %4342 = vpow2.f32 %v1747_v63 }
 0x4ac   : > { %v1749_v15 = vmul.f32 1.442695, %v1722_v23 }
 0x4ad   : > { %v1706_v43 = vpop.xlane.xlu0 %1705 }
 0x4ae   : > { %4344 = vpow2.f32 %v1749_v15  ;;  %v1724_v3 = vsub.f32 %v5115_v22, %v1706_v43 }
 0x4af   : > { %v5200_v29 = vpop.permute.xlu1 %2228  ;;  %4346 = vpow2.f32 %v1751_v13 }
 0x4b0   : > { %v1753_v42 = vmul.f32 1.442695, %v1724_v3 }
 0x4b1   : > { %v1710_v19 = vpop.xlane.xlu0 %1709 }
 0x4b2   : > { %4348 = vpow2.f32 %v1753_v42  ;;  %v1726_v8 = vsub.f32 %v5120_v25, %v1710_v19 }
 0x4b3   : > { %4350 = vpow2.f32 %v1755_v49  ;;  %v5207_v60 = vpop.permute.xlu1 %2230  ;;  %v4274_v49 = vld [vmem:[%s6021_s6 + $0x80] sm:$0xff]  }
 0x4b4   : > { %v5205_v21 = vpop.eup %4340  ;;  %v1757_v34 = vmul.f32 1.442695, %v1726_v8 }
 0x4b5   : > { %v2219_v0 = vpop.permute.xlu0 %2218  ;;  %v1795_v22 = vpack.c.bf16 %v5203_v39, %v5205_v21  ;;  %v5211_v63 = vpop.eup %4342 }
 0x4b6   : > { %4352 = vpow2.f32 %v1757_v34 }
 0x4b7   : > { %4005 = vmatprep.mubr.bf16.mxu0 %v1795_v22  ;;  %v2502_v15 = vpop.permute.xlu1 %2501  ;;  %v4275_v22 = vld [vmem:[%s6021_s6 + $0x88] sm:$0xff]  }
 0x4b8   : > { %v5213_v46 = vpop.eup %4344 }
 0x4b9   : > { %v2500_v51 = vpop.permute.xlu0 %2499  ;;  %v1796_v25 = vpack.c.bf16 %v5213_v46, %v5211_v63  ;;  %v5217_v23 = vpop.eup %4346 }
 0x4ba   : > { %4049 = vmatprep.subr.bf16.mxu1 %v2500_v51 }
 0x4bb   : > { %4006 = vmatmul.mubr.bf16.gmra.mrb[32].mxu0 %v1796_v25  ;;  %4050 = vmatpush3.bf16.msra.mxu1 %v2500_v51  ;;  %v2508_v34 = vpop.permute.xlu1 %2507  ;;  %v4276_v51 = vld [vmem:[%s6021_s6 + $0x90] sm:$0xff]  }
 0x4bc   : > { %v5219_v44 = vpop.eup %4348  ;;  %4051 = vmatprep.subr.bf16.mxu1 %v2502_v15 }
 0x4bd   : > { %v2504_v13 = vpop.permute.xlu0 %2503  ;;  %v1797_v43 = vpack.c.bf16 %v5219_v44, %v5217_v23  ;;  %v5223_v3 = vpop.eup %4350 }
 0x4bf   : > { %4009 = vmatprep.mubr.bf16.mxu0 %v1797_v43  ;;  %4052 = vmatpush3.bf16.msra.mxu1 %v2502_v15  ;;  %v2257_v15 = vsel %vm788_vm2, %v5177_v58, 0  ;;  %v4277_v43 = vld [vmem:[%s6021_s6 + $0x98] sm:$0xff]   ;;  %v4279_v58 = vld [vmem:[%s6021_s6 + $0xa8] sm:$0xff]  }
 0x4c0   : > { %v5225_v42 = vpop.eup %4352  ;;  %4053 = vmatprep.subr.bf16.mxu1 %v2504_v13 }
 0x4c1   : > { %v1798_v19 = vpack.c.bf16 %v5225_v42, %v5223_v3  ;;  %v2506_v8 = vpop.permute.xlu0 %2505 }
 0x4c3   : > { %4010 = vmatmul.mubr.bf16.gmra.mrb[36].mxu0 %v1798_v19  ;;  %4054 = vmatpush3.bf16.msra.mxu1 %v2504_v13  ;;  %v2512_v13 = vpop.permute.xlu1 %2511  ;;  %v4280_v19 = vld [vmem:[%s6021_s6 + $0xb0] sm:$0xff]  }
 0x4c4   : > { %4055 = vmatprep.subr.bf16.mxu1 %v2506_v8  ;;  %4015 = vmatprep.mubr.msk.bf16.mxu0 %vm763_vm1, %v4274_v49  ;;  %v4278_v49 = vld [vmem:[%s6021_s6 + $0xa0] sm:$0xff]  }
 0x4c5   : > { %v2510_v25 = vpop.permute.xlu0 %2509 }
 0x4c7   : > { %4056 = vmatpush3.bf16.msra.mxu1 %v2506_v8  ;;  %v4281_v8 = vld [vmem:[%s6021_s6 + $0xb8] sm:$0xff]  }
 0x4c8   : > { %4057 = vmatprep.subr.bf16.mxu1 %v2508_v34 }
 0x4cb   : > { %4016 = vmatmul.mubr.msk.bf16.vlgmr.msra.gmra.mrb[40].mxu0 %vm763_vm1, %v4275_v22  ;;  %4058 = vmatpush3.bf16.msra.mxu1 %v2508_v34 }
 0x4cc   : > { %4032 = vmatpush3.bf16.msra.mxu0 %v2257_v15  ;;  %4059 = vmatprep.subr.bf16.mxu1 %v2510_v25 }
 0x4cd   : > { %4019 = vmatprep.mubr.msk.bf16.mxu0 %vm763_vm1, %v4276_v51 }
 0x4cf   : > { %4060 = vmatpush3.bf16.msra.mxu1 %v2510_v25 }
 0x4d0   : > { %4061 = vmatprep.subr.bf16.mxu1 %v2512_v13 }
 0x4d3   : > { %4020 = vmatmul.mubr.msk.bf16.gmra.mrb[44].mxu0 %vm763_vm1, %v4277_v43  ;;  %4062 = vmatpush3.bf16.msra.mxu1 %v2512_v13 }
 0x4d4   : > { %4023 = vmatprep.mubr.msk.bf16.mxu0 %vm763_vm1, %v4278_v49 }
 0x4db   : > { %4024 = vmatmul.mubr.msk.bf16.gmra.mrb[48].mxu0 %vm763_vm1, %v4279_v58 }
 0x4dc   : > { %4027 = vmatprep.mubr.msk.bf16.mxu0 %vm763_vm1, %v4280_v19 }
 0x4e3   : > { %4028 = vmatmul.mubr.msk.bf16.gmra.mrb[52].mxu0 %vm763_vm1, %v4281_v8 }
 0x4e4   : > { %4033 = vmatprep.mubr.msk.bf16.mxu0 %vm763_vm1, %v5181_v55 }
 0x4eb   : > { %4034 = vmatmul.mubr.msk.bf16.vlgmr.msra.gmra.mrb[40].mxu0 %vm763_vm1, %v2219_v0 }
 0x4ec   : > { %4037 = vmatprep.mubr.msk.bf16.mxu0 %vm763_vm1, %v5185_v2 }
 0x4f3   : > { %4038 = vmatmul.mubr.msk.bf16.gmra.mrb[44].mxu0 %vm763_vm1, %v5188_v31 }
 0x4f4   : > { %4041 = vmatprep.mubr.msk.bf16.mxu0 %vm763_vm1, %v5192_v26 }
 0x4fb   : > { %4042 = vmatmul.mubr.msk.bf16.gmra.mrb[48].mxu0 %vm763_vm1, %v5196_v28 }
 0x4fc   : > { %4045 = vmatprep.mubr.msk.bf16.mxu0 %vm763_vm1, %v5200_v29 }
 0x503   : > { %4046 = vmatmul.mubr.msk.bf16.gmra.mrb[52].mxu0 %vm763_vm1, %v5207_v60 }
 0x567   : > { %v5278_v55 = vpop.f32.mrb[24].mxu0 }
 0x568   : > { %6050 = vst [vmem:[#allocation21_spill] sm:$0xff] %v5278_v55  ;;  %v5280_v0 = vpop.f32.mrb[25].mxu0 }
 0x569   : > { %6051 = vst [vmem:[#allocation22_spill] sm:$0xff] %v5280_v0  ;;  %v5282_v2 = vpop.f32.mrb[26].mxu0 }
 0x56a   : > { %6052 = vst [vmem:[#allocation23_spill] sm:$0xff] %v5282_v2  ;;  %v5284_v34 = vpop.f32.mrb[27].mxu0 }
 0x56b   : > { %6053 = vst [vmem:[#allocation24_spill] sm:$0xff] %v5284_v34 }
 0x56f   : > { %v5286_v31 = vpop.f32.mrb[28].mxu0 }
 0x570   : > { %6054 = vst [vmem:[#allocation25_spill] sm:$0xff] %v5286_v31  ;;  %v5288_v26 = vpop.f32.mrb[29].mxu0 }
 0x571   : > { %6055 = vst [vmem:[#allocation26_spill] sm:$0xff] %v5288_v26  ;;  %v5290_v22 = vpop.f32.mrb[30].mxu0 }
 0x572   : > { %6056 = vst [vmem:[#allocation27_spill] sm:$0xff] %v5290_v22  ;;  %v5292_v28 = vpop.f32.mrb[31].mxu0 }
 0x573   : > { %6057 = vst [vmem:[#allocation28_spill] sm:$0xff] %v5292_v28 }
 0x58e   : > { %v5294_v29 = vpop.f32.mrb[32].mxu0 }
 0x58f   : > { %6058 = vst [vmem:[#allocation29_spill] sm:$0xff] %v5294_v29  ;;  %v5296_v51 = vpop.f32.mrb[33].mxu0 }
 0x590   : > { %6059 = vst [vmem:[#allocation30_spill] sm:$0xff] %v5296_v51  ;;  %v5298_v60 = vpop.f32.mrb[34].mxu0 }
 0x591   : > { %6060 = vst [vmem:[#allocation31_spill] sm:$0xff] %v5298_v60  ;;  %v5300_v25 = vpop.f32.mrb[35].mxu0 }
 0x592   : > { %6061 = vst [vmem:[#allocation32_spill] sm:$0xff] %v5300_v25 }
 0x596   : > { %v5302_v15 = vpop.f32.mrb[36].mxu0 }
 0x597   : > { %6062 = vst [vmem:[#allocation33_spill] sm:$0xff] %v5302_v15  ;;  %v5304_v13 = vpop.f32.mrb[37].mxu0  ;;  %v4546_v15 = vld [vmem:[%s6022_s7] ss:$0 sm:$0xff] }
 0x598   : > { %6063 = vst [vmem:[#allocation34_spill] sm:$0xff] %v5304_v13  ;;  %v5306_v43 = vpop.f32.mrb[38].mxu0 }
 0x599   : > { %6064 = vst [vmem:[#allocation35_spill] sm:$0xff] %v5306_v43  ;;  %v5308_v49 = vpop.f32.mrb[39].mxu0 }
 0x59a   : > { %6065 = vst [vmem:[#allocation36_spill] sm:$0xff] %v5308_v49 }
 0x5be   : > { %v4035_v58 = vpop.f32.mrb[40].mxu0 }
 0x5bf   : > { %v5311_v19 = vadd.f32 %v4035_v58, %v4791_v27  ;;  %v2293_v8 = vpop.f32.mrb[41].mxu0 }
 0x5c0   : > { %v5314_v32 = vadd.f32 %v4791_v27, %v2293_v8  ;;  %v4036_v48 = vpop.f32.mrb[42].mxu0 }
 0x5c1   : > { %2383 = vmax.xlane.f32.xlu1 %v5311_v19  ;;  %v2296_v29 = vpop.f32.mrb[43].mxu0  ;;  %v5321_v13 = vadd.f32 %v4546_v15, %v4036_v48 }
 0x5c2   : > { %2379 = vmax.xlane.f32.xlu0 %v5314_v32  ;;  %v5324_v51 = vadd.f32 %v4546_v15, %v2296_v29 }
 0x5c5   : > { %2385 = vmax.xlane.f32.xlu1 %v5321_v13 }
 0x5c6   : > { %v4039_v58 = vpop.f32.mrb[44].mxu0 }
 0x5c7   : > { %v2309_v31 = vpop.f32.mrb[45].mxu0  ;;  %v5330_v55 = vadd.f32 %v4546_v15, %v4039_v58 }
 0x5c8   : > { %v5326_v27 = vadd.f32 %v4546_v15, %v2309_v31  ;;  %v4040_v8 = vpop.f32.mrb[46].mxu0 }
 0x5c9   : > { %2381 = vmax.xlane.f32.xlu1 %v5324_v51  ;;  %v2312_v26 = vpop.f32.mrb[47].mxu0  ;;  %v5333_v43 = vadd.f32 %v4546_v15, %v4040_v8 }
 0x5ca   : > { %2387 = vmax.xlane.f32.xlu0 %v5326_v27  ;;  %v5338_v60 = vadd.f32 %v4546_v15, %v2312_v26 }
 0x5cd   : > { %2391 = vmax.xlane.f32.xlu1 %v5330_v55 }
 0x5ce   : > { %v4043_v48 = vpop.f32.mrb[48].mxu0 }
 0x5cf   : > { %v2325_v34 = vpop.f32.mrb[49].mxu0  ;;  %v5344_v22 = vadd.f32 %v4546_v15, %v4043_v48 }
 0x5d0   : > { %v4044_v49 = vpop.f32.mrb[50].mxu0  ;;  %v5350_v26 = vadd.f32 %v4546_v15, %v2325_v34  ;;  %v358_v34 = vld [vmem:[%s6018_s3 + $0x18] sm:$0xff] }
 0x5d1   : > { %v5335_v29 = vadd.f32 %v4546_v15, %v4044_v49  ;;  %2393 = vmax.xlane.f32.xlu1 %v5333_v43  ;;  %v2328_v31 = vpop.f32.mrb[51].mxu0 }
 0x5d2   : > { %v5341_v25 = vadd.f32 %v4546_v15, %v2328_v31 }
 0x5d3   : > { %2401 = vmax.xlane.f32.xlu0 %v5335_v29 }
 0x5d5   : > { %2389 = vmax.xlane.f32.xlu1 %v5338_v60 }
 0x5d6   : > { %v4047_v58 = vpop.f32.mrb[52].mxu0 }
 0x5d7   : > { %2397 = vmax.xlane.f32.xlu0 %v5341_v25  ;;  %v2341_v8 = vpop.f32.mrb[53].mxu0  ;;  %v5356_v0 = vadd.f32 %v4546_v15, %v4047_v58 }
 0x5d8   : > { %v4048_v28 = vpop.f32.mrb[54].mxu0  ;;  %v5360_v48 = vadd.f32 %v4546_v15, %v2341_v8 }
 0x5d9   : > { %v5347_v49 = vadd.f32 %v4546_v15, %v4048_v28  ;;  %2399 = vmax.xlane.f32.xlu1 %v5344_v22  ;;  %v2344_v2 = vpop.f32.mrb[55].mxu0 }
 0x5da   : > { %v5353_v31 = vadd.f32 %v4546_v15, %v2344_v2  ;;  %v362_v2 = vld [vmem:[%s6018_s3 + $0x38] sm:$0xff] }
 0x5db   : > { %2409 = vmax.xlane.f32.xlu0 %v5347_v49 }
 0x5dd   : > { %2395 = vmax.xlane.f32.xlu1 %v5350_v26 }
 0x5df   : > { %2405 = vmax.xlane.f32.xlu0 %v5353_v31 }
 0x5e1   : > { %2407 = vmax.xlane.f32.xlu1 %v5356_v0 }
 0x5e5   : > { %2403 = vmax.xlane.f32.xlu1 %v5360_v48 }
 0x5f5   : > { %2513 = vrot.lane.b32.xlu0 %v4764_v17, %s4560_s17  ;;  %s4562_s17 = smov 72  }
 0x5f6   : > { %380 = vperm.xlu1 %4241, %v358_v34  }
 0x5f9   : > { %400 = vperm.xlu0 %4240, %v362_v2  }
 0x5fa   : > { %2922 = vrot.lane.b32.xlu1 %v4722_v56, %s4561_s23 }
 0x5fd   : > { %2916 = vrot.lane.b32.xlu0 %v4696_v37, %s4561_s23 }
 0x5fe   : > { %2926 = vrot.lane.b32.xlu1 %v4744_v5, %s4561_s23 }
 0x601   : > { %2918 = vrot.lane.b32.xlu0 %v4694_v36, %s4561_s23 }
 0x602   : > { %2930 = vrot.lane.b32.xlu1 %v4764_v17, %s4561_s23 }
 0x605   : > { %2920 = vrot.lane.b32.xlu0 %v4724_v57, %s4561_s23 }
 0x606   : > { %3201 = vrot.lane.b32.xlu1 %v4694_v36, %s4562_s17 }
 0x609   : > { %2924 = vrot.lane.b32.xlu0 %v4746_v6, %s4561_s23 }
 0x60a   : > { %3207 = vrot.lane.b32.xlu1 %v4746_v6, %s4562_s17 }
 0x60d   : > { %2928 = vrot.lane.b32.xlu0 %v4766_v18, %s4561_s23  ;;  %s4563_s23 = smov 8  }
 0x60e   : > { %3211 = vrot.lane.b32.xlu1 %v4766_v18, %s4562_s17 }
 0x611   : > { %3199 = vrot.lane.b32.xlu0 %v4696_v37, %s4562_s17 }
 0x615   : > { %3203 = vrot.lane.b32.xlu0 %v4724_v57, %s4562_s17 }
 0x619   : > { %3205 = vrot.lane.b32.xlu0 %v4722_v56, %s4562_s17 }
 0x61d   : > { %3209 = vrot.lane.b32.xlu0 %v4744_v5, %s4562_s17 }
 0x64e   : > { %v2384_v36 = vpop.xlane.xlu1 %2383 }
 0x64f   : > { %v2380_v28 = vpop.xlane.xlu0 %2379  ;;  %v2413_v4 = vsub.f32 %v5311_v19, %v2384_v36 }
 0x650   : > { %v2411_v6 = vsub.f32 %v5314_v32, %v2380_v28 }
 0x652   : > { %v2386_v15 = vpop.xlane.xlu1 %2385  ;;  %v2427_v58 = vmul.f32 1.442695, %v2411_v6 }
 0x653   : > { %v2414_v2 = vsub.f32 %v5321_v13, %v2386_v15 }
 0x654   : > { %4354 = vpow2.f32 %v2427_v58 }
 0x655   : > { %v2433_v53 = vmul.f32 1.442695, %v2414_v2 }
 0x656   : > { %v2382_v8 = vpop.xlane.xlu1 %2381 }
 0x657   : > { %v2412_v18 = vsub.f32 %v5324_v51, %v2382_v8  ;;  %v2388_v57 = vpop.xlane.xlu0 %2387  ;;  %v2431_v51 = vmul.f32 1.442695, %v2413_v4 }
 0x658   : > { %v2415_v1 = vsub.f32 %v5326_v27, %v2388_v57 }
 0x659   : > { %v2429_v34 = vmul.f32 1.442695, %v2412_v18 }
 0x65a   : > { %v2392_v37 = vpop.xlane.xlu1 %2391  ;;  %v2435_v18 = vmul.f32 1.442695, %v2415_v1 }
 0x65b   : > { %4356 = vpow2.f32 %v2429_v34  ;;  %v2417_v27 = vsub.f32 %v5330_v55, %v2392_v37 }
 0x65c   : > { %4358 = vpow2.f32 %v2433_v53 }
 0x65d   : > { %v2439_v53 = vmul.f32 1.442695, %v2417_v27 }
 0x65e   : > { %v2394_v56 = vpop.xlane.xlu1 %2393  ;;  %v5399_v6 = vpop.eup %4354 }
 0x65f   : > { %v2418_v13 = vsub.f32 %v5333_v43, %v2394_v56 }
 0x660   : > { %v2402_v5 = vpop.xlane.xlu0 %2401 }
 0x661   : > { %v2441_v36 = vmul.f32 1.442695, %v2418_v13  ;;  %v2422_v55 = vsub.f32 %v5335_v29, %v2402_v5 }
 0x662   : > { %v2390_v32 = vpop.xlane.xlu1 %2389 }
 0x663   : > { %v2416_v28 = vsub.f32 %v5338_v60, %v2390_v32  ;;  %v2449_v29 = vmul.f32 1.442695, %v2422_v55 }
 0x664   : > { %v2398_v8 = vpop.xlane.xlu0 %2397 }
 0x665   : > { %v5401_v58 = vpop.eup %4356  ;;  %v2437_v34 = vmul.f32 1.442695, %v2416_v28  ;;  %v2420_v4 = vsub.f32 %v5341_v25, %v2398_v8 }
 0x666   : > { %v2400_v15 = vpop.xlane.xlu1 %2399  ;;  %v2491_v19 = vpack.c.bf16 %v5401_v58, %v5399_v6 }
 0x667   : > { %4360 = vpow2.f32 %v2437_v34  ;;  %v2445_v43 = vmul.f32 1.442695, %v2420_v4  ;;  %v2421_v32 = vsub.f32 %v5344_v22, %v2400_v15 }
 0x668   : > { %4362 = vpow2.f32 %v2431_v51  ;;  %4065 = vmatprep.mubr.bf16.mxu1 %v2491_v19  ;;  %v2410_v60 = vpop.xlane.xlu0 %2409  ;;  %v5410_v51 = vpop.eup %4358 }
 0x669   : > { %4364 = vpow2.f32 %v2435_v18  ;;  %v2447_v18 = vmul.f32 1.442695, %v2421_v32 }
 0x66a   : > { %v2396_v57 = vpop.xlane.xlu1 %2395  ;;  %4366 = vpow2.f32 %v2441_v36 }
 0x66b   : > { %v2419_v1 = vsub.f32 %v5350_v26, %v2396_v57 }
 0x66c   : > { %v2406_v2 = vpop.xlane.xlu0 %2405 }
 0x66d   : > { %v2443_v56 = vmul.f32 1.442695, %v2419_v1  ;;  %v2424_v26 = vsub.f32 %v5353_v31, %v2406_v2 }
 0x66e   : > { %v2408_v28 = vpop.xlane.xlu1 %2407 }
 0x66f   : > { %4368 = vpow2.f32 %v2443_v56  ;;  %v2453_v19 = vmul.f32 1.442695, %v2424_v26  ;;  %v2425_v31 = vsub.f32 %v5356_v0, %v2408_v28 }
 0x670   : > { %4370 = vpow2.f32 %v2439_v53  ;;  %v2514_v37 = vpop.permute.xlu0 %2513 }
 0x671   : > { %v5413_v25 = vpop.eup %4360  ;;  %4372 = vpow2.f32 %v2445_v43  ;;  %4063 = vmatprep.subr.bf16.mxu1 %v2514_v37  ;;  %v2455_v0 = vmul.f32 1.442695, %v2425_v31 }
 0x672   : > { %v5416_v8 = vpop.eup %4362  ;;  %v2404_v34 = vpop.xlane.xlu1 %2403  ;;  %4064 = vmatpush3.bf16.msra.mxu1 %v2514_v37  ;;  %4374 = vpow2.f32 %v2447_v18 }
 0x673   : > { %v5418_v22 = vpop.eup %4364  ;;  %v2423_v13 = vsub.f32 %v5360_v48, %v2404_v34  ;;  %v2492_v15 = vpack.c.bf16 %v5410_v51, %v5416_v8  ;;  %v2426_v48 = vsub.f32 %v5347_v49, %v2410_v60 }
 0x674   : > { %v2493_v5 = vpack.c.bf16 %v5413_v25, %v5418_v22  ;;  %v5427_v57 = vpop.eup %4366 }
 0x675   : > { %v2451_v27 = vmul.f32 1.442695, %v2423_v13  ;;  %4066 = vmatmul.mubr.bf16.vlgmr.msra.gmra.mrb[48].mxu1 %v2492_v15  ;;  %v2457_v60 = vmul.f32 1.442695, %v2426_v48  ;;  %v4282_v48 = vld [vmem:[%s6021_s6 + $0xc0] sm:$0xff]  }
 0x676   : > { %v381_v4 = vpop.permute.xlu1 %380  ;;  %4069 = vmatprep.mubr.bf16.mxu1 %v2493_v5 }
 0x677   : > { %4376 = vpow2.f32 %v2451_v27  ;;  %v494_v36 = vadd.f32 %v4688_v30, %v381_v4 }
 0x678   : > { %4378 = vpow2.f32 %v2449_v29  ;;  %v401_v1 = vpop.permute.xlu0 %400 }
 0x679   : > { %v5430_v53 = vpop.eup %4368  ;;  %4380 = vpow2.f32 %v2453_v19  ;;  %v2733_v2 = vpack.c.bf16 %v494_v36, %v494_v36  ;;  %v510_v43 = vadd.f32 %v4715_v50, %v401_v1 }
 0x67a   : > { %v5433_v56 = vpop.eup %4370  ;;  %4382 = vpow2.f32 %v2455_v0  ;;  %v2923_v26 = vpop.permute.xlu1 %2922 }
 0x67b   : > { %v5435_v32 = vpop.eup %4372  ;;  %v2734_v28 = vpack.c.bf16 %v510_v43, %v510_v43  ;;  %4219 = vmatprep.subr.msk.bf16.mxu1 %vm788_vm2, %v2733_v2  ;;  %v2817_v30 = vsel %vm788_vm2, %v2733_v2, 0  ;;  %v2494_v49 = vpack.c.bf16 %v5427_v57, %v5433_v56  ;;  %4384 = vpow2.f32 %v2457_v60  ;;  %v4284_v60 = vld [vmem:[%s6021_s6 + $0xd0] sm:$0xff]  }
 0x67c   : > { %4082 = vmatpush3.bf16.msra.mxu1 %v2817_v30  ;;  %v5441_v55 = vpop.permute.xlu0 %2916  ;;  %v2495_v50 = vpack.c.bf16 %v5435_v32, %v5430_v53  ;;  %v5446_v37 = vpop.eup %4374  ;;  %v4283_v30 = vld [vmem:[%s6021_s6 + $0xc8] sm:$0xff]  }
 0x67d   : > { %4070 = vmatmul.mubr.bf16.gmra.mrb[52].mxu1 %v2494_v49  ;;  %4220 = vmatprep.subr.msk.bf16.mxu1 %vm788_vm2, %v2734_v28 }
 0x67e   : > { %4073 = vmatprep.mubr.bf16.mxu1 %v2495_v50  ;;  %v2927_v27 = vpop.permute.xlu1 %2926 }
 0x680   : > { %v2919_v18 = vpop.permute.xlu0 %2918 }
 0x681   : > { %v5448_v34 = vpop.eup %4376 }
 0x682   : > { %v5450_v13 = vpop.eup %4378  ;;  %v2931_v2 = vpop.permute.xlu1 %2930 }
 0x683   : > { %v5452_v15 = vpop.eup %4380  ;;  %v2496_v29 = vpack.c.bf16 %v5450_v13, %v5446_v37 }
 0x684   : > { %v2921_v5 = vpop.permute.xlu0 %2920  ;;  %v2497_v19 = vpack.c.bf16 %v5452_v15, %v5448_v34  ;;  %v5458_v31 = vpop.eup %4382 }
 0x685   : > { %4074 = vmatmul.mubr.bf16.gmra.mrb[56].mxu1 %v2496_v29  ;;  %v5460_v36 = vpop.eup %4384  ;;  %v2957_v29 = vsel %vm788_vm2, %v2734_v28, 0  ;;  %v4287_v28 = vld [vmem:[%s6021_s6 + $0xe8] sm:$0xff]  }
 0x686   : > { %4077 = vmatprep.mubr.bf16.mxu1 %v2497_v19  ;;  %v2498_v1 = vpack.c.bf16 %v5460_v36, %v5458_v31  ;;  %v3202_v49 = vpop.permute.xlu1 %3201  ;;  %v4285_v19 = vld [vmem:[%s6021_s6 + $0xd8] sm:$0xff]  }
 0x688   : > { %v2925_v4 = vpop.permute.xlu0 %2924 }
 0x68c   : > { %v2929_v43 = vpop.permute.xlu0 %2928 }
 0x68d   : > { %4078 = vmatmul.mubr.bf16.gmra.mrb[60].mxu1 %v2498_v1  ;;  %v4286_v1 = vld [vmem:[%s6021_s6 + $0xe0] sm:$0xff]  }
 0x68e   : > { %4083 = vmatprep.mubr.msk.bf16.mxu1 %vm763_vm1, %v4282_v48 }
 0x690   : > { %v3200_v0 = vpop.permute.xlu0 %3199 }
 0x691   : > { %4117 = vmatprep.subr.bf16.mxu0 %v3200_v0 }
 0x692   : > { %4118 = vmatpush3.bf16.msra.mxu0 %v3200_v0  ;;  %v3208_v0 = vpop.permute.xlu1 %3207 }
 0x693   : > { %4119 = vmatprep.subr.bf16.mxu0 %v3202_v49 }
 0x694   : > { %v3204_v50 = vpop.permute.xlu0 %3203 }
 0x695   : > { %4084 = vmatmul.mubr.msk.bf16.vlgmr.msra.gmra.mrb[64].mxu1 %vm763_vm1, %v4283_v30 }
 0x696   : > { %4100 = vmatpush3.bf16.msra.mxu1 %v2957_v29  ;;  %4120 = vmatpush3.bf16.msra.mxu0 %v3202_v49  ;;  %v4288_v49 = vld [vmem:[%s6021_s6 + $0xf0] sm:$0xff]  }
 0x697   : > { %4121 = vmatprep.subr.bf16.mxu0 %v3204_v50  ;;  %4087 = vmatprep.mubr.msk.bf16.mxu1 %vm763_vm1, %v4284_v60  ;;  %v3212_v60 = vpop.permute.xlu1 %3211 }
 0x698   : > { %v3206_v48 = vpop.permute.xlu0 %3205 }
 0x69a   : > { %4122 = vmatpush3.bf16.msra.mxu0 %v3204_v50  ;;  %v4289_v50 = vld [vmem:[%s6021_s6 + $0xf8] sm:$0xff]  }
 0x69b   : > { %4123 = vmatprep.subr.bf16.mxu0 %v3206_v48 }
 0x69c   : > { %v3210_v30 = vpop.permute.xlu0 %3209 }
 0x69d   : > { %4088 = vmatmul.mubr.msk.bf16.gmra.mrb[68].mxu1 %vm763_vm1, %v4285_v19 }
 0x69e   : > { %4124 = vmatpush3.bf16.msra.mxu0 %v3206_v48  ;;  %4091 = vmatprep.mubr.msk.bf16.mxu1 %vm763_vm1, %v4286_v1 }
 0x69f   : > { %4125 = vmatprep.subr.bf16.mxu0 %v3208_v0 }
 0x6a2   : > { %4126 = vmatpush3.bf16.msra.mxu0 %v3208_v0 }
 0x6a3   : > { %4127 = vmatprep.subr.bf16.mxu0 %v3210_v30 }
 0x6a5   : > { %4092 = vmatmul.mubr.msk.bf16.gmra.mrb[72].mxu1 %vm763_vm1, %v4287_v28 }
 0x6a6   : > { %4128 = vmatpush3.bf16.msra.mxu0 %v3210_v30  ;;  %4095 = vmatprep.mubr.msk.bf16.mxu1 %vm763_vm1, %v4288_v49 }
 0x6a7   : > { %4129 = vmatprep.subr.bf16.mxu0 %v3212_v60 }
 0x6aa   : > { %4130 = vmatpush3.bf16.msra.mxu0 %v3212_v60  ;;  %v3687_v60 = vld [vmem:[%s6022_s7] ss:$0 sm:$0xff] }
 0x6ad   : > { %4096 = vmatmul.mubr.msk.bf16.gmra.mrb[76].mxu1 %vm763_vm1, %v4289_v50 }
 0x6ae   : > { %4101 = vmatprep.mubr.msk.bf16.mxu1 %vm763_vm1, %v5441_v55 }
 0x6b5   : > { %4102 = vmatmul.mubr.msk.bf16.vlgmr.msra.gmra.mrb[64].mxu1 %vm763_vm1, %v2919_v18 }
 0x6b6   : > { %4105 = vmatprep.mubr.msk.bf16.mxu1 %vm763_vm1, %v2921_v5 }
 0x6bd   : > { %4106 = vmatmul.mubr.msk.bf16.gmra.mrb[68].mxu1 %vm763_vm1, %v2923_v26 }
 0x6be   : > { %4109 = vmatprep.mubr.msk.bf16.mxu1 %vm763_vm1, %v2925_v4 }
 0x6c5   : > { %4110 = vmatmul.mubr.msk.bf16.gmra.mrb[72].mxu1 %vm763_vm1, %v2927_v27 }
 0x6c6   : > { %4113 = vmatprep.mubr.msk.bf16.mxu1 %vm763_vm1, %v2929_v43 }
 0x6cd   : > { %4114 = vmatmul.mubr.msk.bf16.gmra.mrb[76].mxu1 %vm763_vm1, %v2931_v2 }
 0x748   : > { %v5506_v29 = vpop.f32.mrb[48].mxu1 }
 0x749   : > { %6066 = vst [vmem:[#allocation37_spill] sm:$0xff] %v5506_v29  ;;  %v5508_v19 = vpop.f32.mrb[49].mxu1 }
 0x74a   : > { %6067 = vst [vmem:[#allocation38_spill] sm:$0xff] %v5508_v19  ;;  %v5510_v48 = vpop.f32.mrb[50].mxu1 }
 0x74b   : > { %6068 = vst [vmem:[#allocation39_spill] sm:$0xff] %v5510_v48  ;;  %v5512_v55 = vpop.f32.mrb[51].mxu1 }
 0x74c   : > { %6069 = vst [vmem:[#allocation40_spill] sm:$0xff] %v5512_v55 }
 0x750   : > { %v5514_v18 = vpop.f32.mrb[52].mxu1 }
 0x751   : > { %6070 = vst [vmem:[#allocation41_spill] sm:$0xff] %v5514_v18  ;;  %v5516_v5 = vpop.f32.mrb[53].mxu1 }
 0x752   : > { %6071 = vst [vmem:[#allocation42_spill] sm:$0xff] %v5516_v5  ;;  %v5518_v26 = vpop.f32.mrb[54].mxu1 }
 0x753   : > { %6072 = vst [vmem:[#allocation43_spill] sm:$0xff] %v5518_v26  ;;  %v5520_v4 = vpop.f32.mrb[55].mxu1 }
 0x754   : > { %6073 = vst [vmem:[#allocation44_spill] sm:$0xff] %v5520_v4 }
 0x758   : > { %v5522_v27 = vpop.f32.mrb[56].mxu1 }
 0x759   : > { %6074 = vst [vmem:[#allocation45_spill] sm:$0xff] %v5522_v27  ;;  %v5524_v43 = vpop.f32.mrb[57].mxu1 }
 0x75a   : > { %6075 = vst [vmem:[#allocation46_spill] sm:$0xff] %v5524_v43  ;;  %v5526_v2 = vpop.f32.mrb[58].mxu1 }
 0x75b   : > { %6076 = vst [vmem:[#allocation47_spill] sm:$0xff] %v5526_v2  ;;  %v5528_v1 = vpop.f32.mrb[59].mxu1 }
 0x75c   : > { %6077 = vst [vmem:[#allocation48_spill] sm:$0xff] %v5528_v1 }
 0x760   : > { %v5530_v0 = vpop.f32.mrb[60].mxu1 }
 0x761   : > { %6078 = vst [vmem:[#allocation49_spill] sm:$0xff] %v5530_v0  ;;  %v5532_v28 = vpop.f32.mrb[61].mxu1 }
 0x762   : > { %6079 = vst [vmem:[#allocation50_spill] sm:$0xff] %v5532_v28  ;;  %v5534_v30 = vpop.f32.mrb[62].mxu1 }
 0x763   : > { %6080 = vst [vmem:[#allocation51_spill] sm:$0xff] %v5534_v30  ;;  %v5536_v49 = vpop.f32.mrb[63].mxu1 }
 0x764   : > { %6081 = vst [vmem:[#allocation52_spill] sm:$0xff] %v5536_v49 }
 0x788   : > { %v4103_v50 = vpop.f32.mrb[64].mxu1 }
 0x789   : > { %v5541_v27 = vadd.f32 %v4103_v50, %v3687_v60  ;;  %v2993_v29 = vpop.f32.mrb[65].mxu1 }
 0x78a   : > { %v5543_v43 = vadd.f32 %v3687_v60, %v2993_v29  ;;  %v4104_v19 = vpop.f32.mrb[66].mxu1 }
 0x78b   : > { %3083 = vmax.xlane.f32.xlu1 %v5541_v27  ;;  %v2996_v0 = vpop.f32.mrb[67].mxu1  ;;  %v5547_v28 = vadd.f32 %v4104_v19, %v3687_v60 }
 0x78c   : > { %3079 = vmax.xlane.f32.xlu0 %v5543_v43  ;;  %v5550_v49 = vadd.f32 %v3687_v60, %v2996_v0 }
 0x78f   : > { %3085 = vmax.xlane.f32.xlu1 %v5547_v28 }
 0x790   : > { %v4107_v30 = vpop.f32.mrb[68].mxu1 }
 0x791   : > { %v3009_v18 = vpop.f32.mrb[69].mxu1  ;;  %v5556_v5 = vadd.f32 %v4107_v30, %v3687_v60 }
 0x792   : > { %v5552_v2 = vadd.f32 %v3687_v60, %v3009_v18  ;;  %v4108_v50 = vpop.f32.mrb[70].mxu1 }
 0x793   : > { %3081 = vmax.xlane.f32.xlu1 %v5550_v49  ;;  %v3012_v29 = vpop.f32.mrb[71].mxu1  ;;  %6083 = vst [vmem:[#allocation54_spill] sm:$0xff] %v5556_v5  ;;  %v5559_v1 = vadd.f32 %v4108_v50, %v3687_v60 }
 0x794   : > { %6082 = vst [vmem:[#allocation53_spill] sm:$0xff] %v5552_v2  ;;  %3087 = vmax.xlane.f32.xlu0 %v5552_v2  ;;  %v5564_v48 = vadd.f32 %v3687_v60, %v3012_v29 }
 0x795   : > { %6084 = vst [vmem:[#allocation55_spill] sm:$0xff] %v5559_v1 }
 0x797   : > { %3091 = vmax.xlane.f32.xlu1 %v5556_v5 }
 0x798   : > { %v4111_v19 = vpop.f32.mrb[72].mxu1 }
 0x799   : > { %v3025_v26 = vpop.f32.mrb[73].mxu1  ;;  %v5570_v5 = vadd.f32 %v4111_v19, %v3687_v60 }
 0x79a   : > { %v4112_v4 = vpop.f32.mrb[74].mxu1  ;;  %v5576_v29 = vadd.f32 %v3687_v60, %v3025_v26 }
 0x79b   : > { %v5561_v0 = vadd.f32 %v4112_v4, %v3687_v60  ;;  %3093 = vmax.xlane.f32.xlu1 %v5559_v1  ;;  %v3028_v18 = vpop.f32.mrb[75].mxu1 }
 0x79c   : > { %v5567_v55 = vadd.f32 %v3687_v60, %v3028_v18 }
 0x79d   : > { %6085 = vst [vmem:[#allocation56_spill] sm:$0xff] %v5561_v0  ;;  %3101 = vmax.xlane.f32.xlu0 %v5561_v0 }
 0x79f   : > { %3089 = vmax.xlane.f32.xlu1 %v5564_v48 }
 0x7a0   : > { %v4115_v30 = vpop.f32.mrb[76].mxu1 }
 0x7a1   : > { %3097 = vmax.xlane.f32.xlu0 %v5567_v55  ;;  %v3041_v50 = vpop.f32.mrb[77].mxu1  ;;  %v5582_v0 = vadd.f32 %v4115_v30, %v3687_v60 }
 0x7a2   : > { %v4116_v2 = vpop.f32.mrb[78].mxu1  ;;  %v5586_v19 = vadd.f32 %v3687_v60, %v3041_v50 }
 0x7a3   : > { %v5573_v4 = vadd.f32 %v4116_v2, %v3687_v60  ;;  %3099 = vmax.xlane.f32.xlu1 %v5570_v5  ;;  %v3044_v1 = vpop.f32.mrb[79].mxu1 }
 0x7a4   : > { %v5579_v18 = vadd.f32 %v3687_v60, %v3044_v1 }
 0x7a5   : > { %3109 = vmax.xlane.f32.xlu0 %v5573_v4 }
 0x7a7   : > { %3095 = vmax.xlane.f32.xlu1 %v5576_v29 }
 0x7a9   : > { %3105 = vmax.xlane.f32.xlu0 %v5579_v18 }
 0x7ab   : > { %3107 = vmax.xlane.f32.xlu1 %v5582_v0 }
 0x7af   : > { %3103 = vmax.xlane.f32.xlu1 %v5586_v19 }
 0x7b3   : > { %1759 = vadd.xlane.f32.xlu1 %v5145_v45  ;;  %v6087_v45 = vld [vmem:[#allocation3_spill] sm:$0xff] }
 0x7b7   : > { %1763 = vadd.xlane.f32.xlu1 %v5161_v12 }
 0x7bb   : > { %1765 = vadd.xlane.f32.xlu1 %v5157_v47  ;;  %v6088_v47 = vld [vmem:[#allocation4_spill] sm:$0xff] }
 0x7bf   : > { %1767 = vadd.xlane.f32.xlu1 %v5163_v41  ;;  %3213 = vrot.lane.b32.xlu0 %v4764_v17, %s4562_s17  ;;  %s4564_s17 = smov 16  }
 0x7c3   : > { %1769 = vadd.xlane.f32.xlu1 %v5159_v54  ;;  %v6089_v54 = vld [vmem:[#allocation53_spill] sm:$0xff] }
 0x7c7   : > { %1771 = vadd.xlane.f32.xlu1 %v5175_v14 }
 0x7cb   : > { %1773 = vadd.xlane.f32.xlu1 %v5170_v62 }
 0x7cf   : > { %1775 = vadd.xlane.f32.xlu1 %v5205_v21 }
 0x7d3   : > { %1777 = vadd.xlane.f32.xlu1 %v5203_v39 }
 0x7d7   : > { %1781 = vadd.xlane.f32.xlu1 %v5213_v46 }
 0x7db   : > { %1785 = vadd.xlane.f32.xlu1 %v5219_v44 }
 0x7de   : > { %1761 = vadd.xlane.f32.xlu0 %v5148_v52 }
 0x7df   : > { %1789 = vadd.xlane.f32.xlu1 %v5225_v42 }
 0x7e2   : > { %1779 = vadd.xlane.f32.xlu0 %v5211_v63 }
 0x7e3   : > { %2461 = vadd.xlane.f32.xlu1 %v5401_v58 }
 0x7e6   : > { %1783 = vadd.xlane.f32.xlu0 %v5217_v23 }
 0x7e7   : > { %2465 = vadd.xlane.f32.xlu1 %v5410_v51  ;;  %v6091_v51 = vld [vmem:[#allocation54_spill] sm:$0xff] }
 0x7ea   : > { %1787 = vadd.xlane.f32.xlu0 %v5223_v3  ;;  %v6090_v3 = vld [vmem:[#allocation55_spill] sm:$0xff] }
 0x7eb   : > { %2469 = vadd.xlane.f32.xlu1 %v5413_v25 }
 0x7ee   : > { %2459 = vadd.xlane.f32.xlu0 %v5399_v6 }
 0x7ef   : > { %2473 = vadd.xlane.f32.xlu1 %v5427_v57 }
 0x7f2   : > { %2463 = vadd.xlane.f32.xlu0 %v5416_v8 }
 0x7f3   : > { %2477 = vadd.xlane.f32.xlu1 %v5435_v32 }
 0x7f6   : > { %2467 = vadd.xlane.f32.xlu0 %v5418_v22 }
 0x7f7   : > { %2481 = vadd.xlane.f32.xlu1 %v5450_v13 }
 0x7fa   : > { %2471 = vadd.xlane.f32.xlu0 %v5433_v56 }
 0x7fb   : > { %2485 = vadd.xlane.f32.xlu1 %v5452_v15 }
 0x7fe   : > { %2475 = vadd.xlane.f32.xlu0 %v5430_v53 }
 0x7ff   : > { %2489 = vadd.xlane.f32.xlu1 %v5460_v36 }
 0x802   : > { %2479 = vadd.xlane.f32.xlu0 %v5446_v37 }
 0x803   : > { %1118 = vadd.xlane.f32.xlu1 %v4895_v40 }
 0x806   : > { %2483 = vadd.xlane.f32.xlu0 %v5448_v34  ;;  %v6092_v34 = vld [vmem:[#allocation56_spill] sm:$0xff] }
 0x807   : > { %1122 = vadd.xlane.f32.xlu1 %v4906_v61 }
 0x80a   : > { %2487 = vadd.xlane.f32.xlu0 %v5458_v31 }
 0x80b   : > { %1126 = vadd.xlane.f32.xlu1 %v4913_v11 }
 0x80e   : > { %1116 = vadd.xlane.f32.xlu0 %v4893_v35 }
 0x80f   : > { %1130 = vadd.xlane.f32.xlu1 %v4927_v24 }
 0x812   : > { %1120 = vadd.xlane.f32.xlu0 %v4911_v59 }
 0x813   : > { %1134 = vadd.xlane.f32.xlu1 %v4929_v33 }
 0x816   : > { %1124 = vadd.xlane.f32.xlu0 %v4909_v9  ;;  %v6086_v9 = vld [vmem:[#allocation2_spill] sm:$0xff] }
 0x817   : > { %1138 = vadd.xlane.f32.xlu1 %v4942_v38 }
 0x818   : > { %v3084_v17 = vpop.xlane.xlu1 %3083 }
 0x819   : > { %v3080_v40 = vpop.xlane.xlu0 %3079 }
 0x81a   : > { %1128 = vadd.xlane.f32.xlu0 %v4920_v16  ;;  %v3111_v61 = vsub.f32 %v5543_v43, %v3080_v40 }
 0x81b   : > { %1142 = vadd.xlane.f32.xlu1 %v4959_v7 }
 0x81c   : > { %v3086_v11 = vpop.xlane.xlu1 %3085  ;;  %v3127_v35 = vmul.f32 1.442695, %v3111_v61 }
 0x81d   : > { %v3114_v7 = vsub.f32 %v5547_v28, %v3086_v11 }
 0x81e   : > { %1132 = vadd.xlane.f32.xlu0 %v4922_v20  ;;  %4386 = vpow2.f32 %v3127_v35  ;;  %v3113_v20 = vsub.f32 %v5541_v27, %v3084_v17 }
 0x81f   : > { %1146 = vadd.xlane.f32.xlu1 %v4965_v10  ;;  %v3133_v41 = vmul.f32 1.442695, %v3114_v7 }
 0x820   : > { %v3082_v59 = vpop.xlane.xlu1 %3081  ;;  %v3131_v21 = vmul.f32 1.442695, %v3113_v20 }
 0x821   : > { %v3112_v24 = vsub.f32 %v5550_v49, %v3082_v59  ;;  %v3088_v16 = vpop.xlane.xlu0 %3087 }
 0x822   : > { %1136 = vadd.xlane.f32.xlu0 %v6086_v9  ;;  %v3115_v12 = vsub.f32 %v6089_v54, %v3088_v16 }
 0x823   : > { %v3129_v33 = vmul.f32 1.442695, %v3112_v24 }
 0x824   : > { %v3092_v38 = vpop.xlane.xlu1 %3091  ;;  %v3135_v23 = vmul.f32 1.442695, %v3115_v12 }
 0x825   : > { %4388 = vpow2.f32 %v3129_v33  ;;  %v3117_v25 = vsub.f32 %v6091_v51, %v3092_v38 }
 0x826   : > { %1140 = vadd.xlane.f32.xlu0 %v6087_v45  ;;  %4390 = vpow2.f32 %v3133_v41 }
 0x827   : > { %v3139_v32 = vmul.f32 1.442695, %v3117_v25  ;;  %v6095_v25 = vld [vmem:[#allocation28_spill] sm:$0xff] }
 0x828   : > { %v3094_v52 = vpop.xlane.xlu1 %3093  ;;  %v5645_v39 = vpop.eup %4386 }
 0x829   : > { %v3118_v42 = vsub.f32 %v6090_v3, %v3094_v52 }
 0x82a   : > { %1144 = vadd.xlane.f32.xlu0 %v6088_v47  ;;  %v3102_v10 = vpop.xlane.xlu0 %3101 }
 0x82b   : > { %v3141_v57 = vmul.f32 1.442695, %v3118_v42  ;;  %v3122_v13 = vsub.f32 %v6092_v34, %v3102_v10  ;;  %v6093_v10 = vld [vmem:[#allocation22_spill] sm:$0xff] }
 0x82c   : > { %v3090_v62 = vpop.xlane.xlu1 %3089 }
 0x82d   : > { %v3116_v14 = vsub.f32 %v5564_v48, %v3090_v62  ;;  %v3149_v43 = vmul.f32 1.442695, %v3122_v13 }
 0x82e   : > { %v3098_v63 = vpop.xlane.xlu0 %3097 }
 0x82f   : > { %v5647_v46 = vpop.eup %4388  ;;  %v3137_v44 = vmul.f32 1.442695, %v3116_v14  ;;  %v3120_v22 = vsub.f32 %v5567_v55, %v3098_v63 }
 0x830   : > { %v3100_v6 = vpop.xlane.xlu1 %3099  ;;  %v3191_v58 = vpack.c.bf16 %v5647_v46, %v5645_v39  ;;  %v5657_v26 = vpop.eup %4390 }
 0x831   : > { %4392 = vpow2.f32 %v3137_v44  ;;  %v3145_v15 = vmul.f32 1.442695, %v3120_v22  ;;  %v3121_v36 = vsub.f32 %v5570_v5, %v3100_v6  ;;  %v6094_v44 = vld [vmem:[#allocation23_spill] sm:$0xff] }
 0x832   : > { %4394 = vpow2.f32 %v3131_v21  ;;  %4133 = vmatprep.mubr.bf16.mxu0 %v3191_v58  ;;  %v3110_v8 = vpop.xlane.xlu0 %3109 }
 0x833   : > { %4396 = vpow2.f32 %v3135_v23  ;;  %v3147_v28 = vmul.f32 1.442695, %v3121_v36 }
 0x834   : > { %v3096_v53 = vpop.xlane.xlu1 %3095  ;;  %4398 = vpow2.f32 %v3141_v57 }
 0x835   : > { %v3119_v56 = vsub.f32 %v5576_v29, %v3096_v53 }
 0x836   : > { %v3106_v37 = vpop.xlane.xlu0 %3105 }
 0x837   : > { %v3143_v31 = vmul.f32 1.442695, %v3119_v56  ;;  %v3124_v2 = vsub.f32 %v5579_v18, %v3106_v37  ;;  %v6096_v56 = vld [vmem:[#allocation27_spill] sm:$0xff] }
 0x838   : > { %v3108_v48 = vpop.xlane.xlu1 %3107 }
 0x839   : > { %4400 = vpow2.f32 %v3143_v31  ;;  %v3153_v29 = vmul.f32 1.442695, %v3124_v2  ;;  %v3125_v18 = vsub.f32 %v5582_v0, %v3108_v48  ;;  %v6097_v31 = vld [vmem:[#allocation32_spill] sm:$0xff]  ;;  %v6098_v2 = vld [vmem:[#allocation31_spill] sm:$0xff] }
 0x83a   : > { %4402 = vpow2.f32 %v3139_v32  ;;  %v3214_v27 = vpop.permute.xlu0 %3213 }
 0x83b   : > { %v5659_v55 = vpop.eup %4392  ;;  %4404 = vpow2.f32 %v3145_v15  ;;  %4131 = vmatprep.subr.bf16.mxu0 %v3214_v27  ;;  %v3155_v59 = vmul.f32 1.442695, %v3125_v18 }
 0x83c   : > { %v5662_v1 = vpop.eup %4394  ;;  %v3104_v49 = vpop.xlane.xlu1 %3103  ;;  %4132 = vmatpush3.bf16.msra.mxu0 %v3214_v27  ;;  %4406 = vpow2.f32 %v3149_v43 }
 0x83d   : > { %v5664_v60 = vpop.eup %4396  ;;  %v3123_v5 = vsub.f32 %v5586_v19, %v3104_v49  ;;  %v3192_v30 = vpack.c.bf16 %v5657_v26, %v5662_v1  ;;  %4408 = vpow2.f32 %v3147_v28  ;;  %v3126_v19 = vsub.f32 %v5573_v4, %v3110_v8 }
 0x83e   : > { %v3193_v50 = vpack.c.bf16 %v5659_v55, %v5664_v60  ;;  %v5672_v61 = vpop.eup %4398 }
 0x83f   : > { %v3151_v17 = vmul.f32 1.442695, %v3123_v5  ;;  %4134 = vmatmul.mubr.bf16.vlgmr.msra.gmra.mrb[56].mxu0 %v3192_v30  ;;  %v3157_v33 = vmul.f32 1.442695, %v3126_v19  ;;  %v6100_v19 = vld [vmem:[#allocation24_spill] sm:$0xff] }
 0x840   : > { %v1760_v40 = vpop.xlane.xlu1 %1759  ;;  %4137 = vmatprep.mubr.bf16.mxu0 %v3193_v50  ;;  %v6099_v50 = vld [vmem:[#allocation36_spill] sm:$0xff] }
 0x841   : > { %4410 = vpow2.f32 %v3151_v17 }
 0x842   : > { %4412 = vrcp.f32 %v1760_v40 }
 0x843   : > { %v5675_v11 = vpop.eup %4400  ;;  %4414 = vpow2.f32 %v3153_v29 }
 0x844   : > { %v5677_v35 = vpop.eup %4402  ;;  %v1764_v24 = vpop.xlane.xlu1 %1763  ;;  %4416 = vpow2.f32 %v3155_v59 }
 0x845   : > { %v5679_v9 = vpop.eup %4404  ;;  %v3194_v0 = vpack.c.bf16 %v5672_v61, %v5677_v35 }
 0x846   : > { %v3195_v38 = vpack.c.bf16 %v5679_v9, %v5675_v11  ;;  %v5685_v16 = vpop.eup %4406 }
 0x847   : > { %4138 = vmatmul.mubr.bf16.gmra.mrb[60].mxu0 %v3194_v0  ;;  %v5687_v45 = vpop.eup %4408 }
 0x848   : > { %v1766_v4 = vpop.xlane.xlu1 %1765  ;;  %4141 = vmatprep.mubr.bf16.mxu0 %v3195_v38  ;;  %v3196_v12 = vpack.c.bf16 %v5685_v16, %v5687_v45 }
 0x849   : > { %4418 = vrcp.f32 %v1766_v4 }
 0x84a   : > { %4420 = vpow2.f32 %v3157_v33  ;;  %v6101_v33 = vld [vmem:[#allocation35_spill] sm:$0xff] }
 0x84b   : > { %v5689_v7 = vpop.eup %4410 }
 0x84c   : > { %v4413_v52 = vpop.eup %4412  ;;  %v1768_v20 = vpop.xlane.xlu1 %1767 }
 0x84d   : > { %v5691_v47 = vpop.eup %4414  ;;  %v1936_v54 = vmul.f32 %v4413_v52, %v6093_v10 }
 0x84e   : > { %v3197_v41 = vpack.c.bf16 %v5691_v47, %v5689_v7  ;;  %v5699_v14 = vpop.eup %4416 }
 0x84f   : > { %1968 = vrot.lane.b32.xlu0 %v1936_v54, %s4563_s23  ;;  %4142 = vmatmul.mubr.bf16.gmra.mrb[64].mxu0 %v3196_v12 }
 0x850   : > { %v1770_v62 = vpop.xlane.xlu1 %1769  ;;  %4145 = vmatprep.mubr.bf16.mxu0 %v3197_v41  ;;  %v6103_v41 = vld [vmem:[#allocation40_spill] sm:$0xff] }
 0x851   : > { %4422 = vrcp.f32 %v1770_v62 }
 0x853   : > { %v4419_v21 = vpop.eup %4418 }
 0x854   : > { %v5701_v63 = vpop.eup %4420  ;;  %v1772_v23 = vpop.xlane.xlu1 %1771  ;;  %v1939_v3 = vmul.f32 %v4419_v21, %v6094_v44  ;;  %v6104_v44 = vld [vmem:[#allocation26_spill] sm:$0xff] }
 0x855   : > { %v3198_v42 = vpack.c.bf16 %v5701_v63, %v5699_v14 }
 0x856   : > { %1974 = vrot.lane.b32.xlu0 %v1939_v3, %s4563_s23 }
 0x857   : > { %4146 = vmatmul.mubr.bf16.gmra.mrb[68].mxu0 %v3198_v42 }
 0x858   : > { %v1774_v6 = vpop.xlane.xlu1 %1773 }
 0x859   : > { %4424 = vrcp.f32 %v1774_v6 }
 0x85b   : > { %v4423_v58 = vpop.eup %4422 }
 0x85c   : > { %v1776_v51 = vpop.xlane.xlu1 %1775  ;;  %v1941_v8 = vmul.f32 %v4423_v58, %v6095_v25  ;;  %v6105_v58 = vld [vmem:[#allocation39_spill] sm:$0xff] }
 0x85e   : > { %1978 = vrot.lane.b32.xlu0 %v1941_v8, %s4563_s23 }
 0x860   : > { %v1778_v22 = vpop.xlane.xlu1 %1777 }
 0x861   : > { %4426 = vrcp.f32 %v1778_v22  ;;  %v6106_v22 = vld [vmem:[#allocation25_spill] sm:$0xff] }
 0x863   : > { %v4425_v57 = vpop.eup %4424 }
 0x864   : > { %v1782_v53 = vpop.xlane.xlu1 %1781  ;;  %v1943_v32 = vmul.f32 %v4425_v57, %v6096_v56 }
 0x865   : > { %4428 = vrcp.f32 %v1782_v53 }
 0x866   : > { %1982 = vrot.lane.b32.xlu0 %v1943_v32, %s4563_s23  ;;  %v6107_v32 = vld [vmem:[#allocation44_spill] sm:$0xff] }
 0x868   : > { %v1786_v37 = vpop.xlane.xlu1 %1785 }
 0x869   : > { %4430 = vrcp.f32 %v1786_v37 }
 0x86b   : > { %v4427_v34 = vpop.eup %4426  ;;  %v1762_v13 = vpop.xlane.xlu0 %1761 }
 0x86c   : > { %4432 = vrcp.f32 %v1762_v13  ;;  %v1790_v15 = vpop.xlane.xlu1 %1789  ;;  %v1945_v36 = vmul.f32 %v4427_v34, %v6097_v31 }
 0x86d   : > { %4434 = vrcp.f32 %v1790_v15  ;;  %v6108_v15 = vld [vmem:[#allocation30_spill] sm:$0xff] }
 0x86e   : > { %4436 = vrcp.f32 %v1764_v24  ;;  %1986 = vrot.lane.b32.xlu0 %v1945_v36, %s4563_s23 }
 0x86f   : > { %v4429_v48 = vpop.eup %4428  ;;  %v1780_v27 = vpop.xlane.xlu0 %1779 }
 0x870   : > { %v2462_v43 = vpop.xlane.xlu1 %2461  ;;  %v1947_v28 = vmul.f32 %v4429_v48, %v6098_v2 }
 0x871   : > { %4438 = vrcp.f32 %v2462_v43 }
 0x872   : > { %4440 = vrcp.f32 %v1768_v20  ;;  %1990 = vrot.lane.b32.xlu0 %v1947_v28, %s4563_s23  ;;  %v6102_v20 = vld [vmem:[#allocation21_spill] sm:$0xff] }
 0x873   : > { %v4431_v49 = vpop.eup %4430  ;;  %v1784_v5 = vpop.xlane.xlu0 %1783 }
 0x874   : > { %v2466_v30 = vpop.xlane.xlu1 %2465  ;;  %v1949_v29 = vmul.f32 %v4431_v49, %v6099_v50  ;;  %v6110_v49 = vld [vmem:[#allocation29_spill] sm:$0xff] }
 0x875   : > { %4442 = vrcp.f32 %v2466_v30 }
 0x876   : > { %v4433_v17 = vpop.eup %4432  ;;  %4444 = vrcp.f32 %v1772_v23  ;;  %1994 = vrot.lane.b32.xlu0 %v1949_v29, %s4563_s23  ;;  %v6111_v29 = vld [vmem:[#allocation48_spill] sm:$0xff] }
 0x877   : > { %v4435_v18 = vpop.eup %4434  ;;  %v1788_v40 = vpop.xlane.xlu0 %1787  ;;  %v1937_v59 = vmul.f32 %v4433_v17, %v6100_v19 }
 0x878   : > { %v4437_v24 = vpop.eup %4436  ;;  %v2470_v0 = vpop.xlane.xlu1 %2469  ;;  %v1951_v38 = vmul.f32 %v4435_v18, %v6101_v33 }
 0x879   : > { %4446 = vrcp.f32 %v2470_v0  ;;  %1970 = vrot.lane.b32.xlu1 %v1937_v59, %s4563_s23  ;;  %v1938_v10 = vmul.f32 %v4437_v24, %v6102_v20  ;;  %v6112_v59 = vld [vmem:[#allocation34_spill] sm:$0xff] }
 0x87a   : > { %4448 = vrcp.f32 %v1776_v51  ;;  %1998 = vrot.lane.b32.xlu0 %v1951_v38, %s4563_s23  ;;  %v6113_v0 = vld [vmem:[#allocation42_spill] sm:$0xff] }
 0x87b   : > { %v4439_v4 = vpop.eup %4438  ;;  %v2460_v52 = vpop.xlane.xlu0 %2459 }
 0x87c   : > { %v4441_v54 = vpop.eup %4440  ;;  %v2474_v12 = vpop.xlane.xlu1 %2473  ;;  %v2637_v62 = vmul.f32 %v4439_v4, %v6103_v41  ;;  %v6115_v41 = vld [vmem:[#allocation33_spill] sm:$0xff] }
 0x87d   : > { %4450 = vrcp.f32 %v2474_v12  ;;  %1972 = vrot.lane.b32.xlu1 %v1938_v10, %s4563_s23  ;;  %v1940_v3 = vmul.f32 %v4441_v54, %v6104_v44 }
 0x87e   : > { %4452 = vrcp.f32 %v1780_v27  ;;  %2670 = vrot.lane.b32.xlu0 %v2637_v62, %s4564_s17  ;;  %v6109_v27 = vld [vmem:[#allocation43_spill] sm:$0xff] }
 0x87f   : > { %v4443_v21 = vpop.eup %4442  ;;  %v2464_v23 = vpop.xlane.xlu0 %2463 }
 0x880   : > { %v4445_v42 = vpop.eup %4444  ;;  %v2478_v6 = vpop.xlane.xlu1 %2477  ;;  %v5727_v51 = vmul.f32 %v4443_v21, %v6105_v58  ;;  %v6116_v21 = vld [vmem:[#allocation41_spill] sm:$0xff] }
 0x881   : > { %4454 = vrcp.f32 %v2478_v6  ;;  %1976 = vrot.lane.b32.xlu1 %v1940_v3, %s4563_s23  ;;  %v1942_v57 = vmul.f32 %v4445_v42, %v6106_v22  ;;  %v6117_v42 = vld [vmem:[#allocation52_spill] sm:$0xff]  ;;  %v6118_v22 = vld [vmem:[#allocation38_spill] sm:$0xff] }
 0x882   : > { %4456 = vrcp.f32 %v1784_v5 }
 0x883   : > { %v4447_v25 = vpop.eup %4446  ;;  %v2468_v8 = vpop.xlane.xlu0 %2467 }
 0x884   : > { %v4449_v53 = vpop.eup %4448  ;;  %4458 = vrcp.f32 %v2468_v8  ;;  %v2482_v56 = vpop.xlane.xlu1 %2481  ;;  %v5732_v37 = vmul.f32 %v4447_v25, %v6107_v32 }
 0x885   : > { %4460 = vrcp.f32 %v2482_v56  ;;  %1980 = vrot.lane.b32.xlu1 %v1942_v57, %s4563_s23  ;;  %v1944_v31 = vmul.f32 %v4449_v53, %v6108_v15  ;;  %v6119_v53 = vld [vmem:[#allocation46_spill] sm:$0xff] }
 0x886   : > { %4462 = vrcp.f32 %v1788_v40 }
 0x887   : > { %v4451_v34 = vpop.eup %4450  ;;  %v2472_v13 = vpop.xlane.xlu0 %2471 }
 0x888   : > { %v4453_v36 = vpop.eup %4452  ;;  %4464 = vrcp.f32 %v2472_v13  ;;  %v2486_v48 = vpop.xlane.xlu1 %2485  ;;  %v5737_v43 = vmul.f32 %v4451_v34, %v6109_v27  ;;  %v6120_v13 = vld [vmem:[#allocation51_spill] sm:$0xff]  ;;  %v6121_v27 = vld [vmem:[#allocation37_spill] sm:$0xff] }
 0x889   : > { %4466 = vrcp.f32 %v2486_v48  ;;  %1984 = vrot.lane.b32.xlu1 %v1944_v31, %s4563_s23  ;;  %v1946_v5 = vmul.f32 %v4453_v36, %v6110_v49 }
 0x88a   : > { %4468 = vrcp.f32 %v2460_v52  ;;  %v6114_v52 = vld [vmem:[#allocation47_spill] sm:$0xff] }
 0x88b   : > { %v4455_v2 = vpop.eup %4454  ;;  %v2476_v28 = vpop.xlane.xlu0 %2475 }
 0x88c   : > { %v4457_v30 = vpop.eup %4456  ;;  %4470 = vrcp.f32 %v2476_v28  ;;  %v2490_v50 = vpop.xlane.xlu1 %2489  ;;  %v5742_v17 = vmul.f32 %v4455_v2, %v6111_v29  ;;  %v6122_v28 = vld [vmem:[#allocation45_spill] sm:$0xff] }
 0x88d   : > { %4472 = vrcp.f32 %v2490_v50  ;;  %1988 = vrot.lane.b32.xlu1 %v1946_v5, %s4563_s23  ;;  %v1948_v24 = vmul.f32 %v4457_v30, %v6112_v59  ;;  %v6123_v5 = vld [vmem:[#allocation8_spill] sm:$0xff] }
 0x88e   : > { %v4459_v18 = vpop.eup %4458  ;;  %4474 = vrcp.f32 %v2464_v23 }
 0x88f   : > { %v4461_v40 = vpop.eup %4460  ;;  %v2480_v19 = vpop.xlane.xlu0 %2479  ;;  %v5747_v33 = vmul.f32 %v4459_v18, %v6113_v0 }
 0x890   : > { %v4463_v38 = vpop.eup %4462  ;;  %4476 = vrcp.f32 %v2480_v19  ;;  %v1119_v4 = vpop.xlane.xlu1 %1118  ;;  %v5750_v20 = vmul.f32 %v4461_v40, %v6114_v52  ;;  %v6124_v19 = vld [vmem:[#allocation50_spill] sm:$0xff] }
 0x891   : > { %4478 = vrcp.f32 %v1119_v4  ;;  %1992 = vrot.lane.b32.xlu1 %v1948_v24, %s4563_s23  ;;  %v1950_v62 = vmul.f32 %v4463_v38, %v6115_v41  ;;  %v6125_v24 = vld [vmem:[#allocation7_spill] sm:$0xff] }
 0x892   : > { %v4465_v10 = vpop.eup %4464 }
 0x893   : > { %v4467_v54 = vpop.eup %4466  ;;  %v2484_v12 = vpop.xlane.xlu0 %2483  ;;  %v5755_v23 = vmul.f32 %v4465_v10, %v6116_v21  ;;  %v6126_v10 = vld [vmem:[#allocation49_spill] sm:$0xff] }
 0x894   : > { %v4469_v44 = vpop.eup %4468  ;;  %4480 = vrcp.f32 %v2484_v12  ;;  %v1123_v3 = vpop.xlane.xlu1 %1122  ;;  %v5758_v6 = vmul.f32 %v4467_v54, %v6117_v42  ;;  %v6127_v12 = vld [vmem:[#allocation12_spill] sm:$0xff] }
 0x895   : > { %4482 = vrcp.f32 %v1123_v3  ;;  %1996 = vrot.lane.b32.xlu1 %v1950_v62, %s4563_s23  ;;  %v2636_v57 = vmul.f32 %v4469_v44, %v6118_v22  ;;  %v6128_v44 = vld [vmem:[#allocation6_spill] sm:$0xff] }
 0x896   : > { %v4471_v58 = vpop.eup %4470 }
 0x897   : > { %v4473_v25 = vpop.eup %4472  ;;  %v2488_v8 = vpop.xlane.xlu0 %2487  ;;  %v5763_v56 = vmul.f32 %v4471_v58, %v6119_v53  ;;  %v6129_v58 = vld [vmem:[#allocation11_spill] sm:$0xff] }
 0x898   : > { %v4475_v32 = vpop.eup %4474  ;;  %4484 = vrcp.f32 %v2488_v8  ;;  %v1127_v34 = vpop.xlane.xlu1 %1126  ;;  %v5767_v15 = vmul.f32 %v4473_v25, %v6120_v13 }
 0x899   : > { %4486 = vrcp.f32 %v1127_v34  ;;  %2668 = vrot.lane.b32.xlu1 %v2636_v57, %s4564_s17  ;;  %v2638_v2 = vmul.f32 %v4475_v32, %v6121_v27  ;;  %v6130_v57 = vld [vmem:[#allocation5_spill] sm:$0xff]  ;;  %v6131_v34 = vld [vmem:[#allocation16_spill] sm:$0xff] }
 0x89a   : > { %v4477_v31 = vpop.eup %4476 }
 0x89b   : > { %v4479_v36 = vpop.eup %4478  ;;  %v1117_v48 = vpop.xlane.xlu0 %1116  ;;  %v5777_v49 = vmul.f32 %v4477_v31, %v6122_v28  ;;  %v6133_v28 = vld [vmem:[#allocation15_spill] sm:$0xff] }
 0x89c   : > { %v1302_v30 = vmul.f32 %v4479_v36, %v6123_v5  ;;  %4488 = vrcp.f32 %v1117_v48  ;;  %v1131_v50 = vpop.xlane.xlu1 %1130  ;;  %v6132_v48 = vld [vmem:[#allocation10_spill] sm:$0xff] }
 0x89d   : > { %4490 = vrcp.f32 %v1131_v50  ;;  %3163 = vadd.xlane.f32.xlu0 %v5662_v1  ;;  %2672 = vrot.lane.b32.xlu1 %v2638_v2, %s4564_s17  ;;  %v6134_v50 = vld [vmem:[#allocation9_spill] sm:$0xff] }
 0x89e   : > { %v4481_v29 = vpop.eup %4480  ;;  %1318 = vst.msk [vmem:[%s5773_s29 + $0x8] sm:$0xff] %vm763_vm1, %v1302_v30 }
 0x89f   : > { %v4483_v18 = vpop.eup %4482  ;;  %v1121_v40 = vpop.xlane.xlu0 %1120  ;;  %v5785_v59 = vmul.f32 %v4481_v29, %v6124_v19 }
 0x8a0   : > { %v1304_v0 = vmul.f32 %v4483_v18, %v6125_v24  ;;  %4492 = vrcp.f32 %v1121_v40  ;;  %v1135_v38 = vpop.xlane.xlu1 %1134  ;;  %v6135_v40 = vld [vmem:[#allocation20_spill] sm:$0xff] }
 0x8a1   : > { %4494 = vrcp.f32 %v1135_v38  ;;  %3159 = vadd.xlane.f32.xlu0 %v5645_v39 }
 0x8a2   : > { %v4485_v4 = vpop.eup %4484  ;;  %1320 = vst.msk [vmem:[%s5773_s29 + $0x18] sm:$0xff] %vm763_vm1, %v1304_v0  ;;  %v6136_v0 = vld [vmem:[#allocation14_spill] sm:$0xff] }
 0x8a3   : > { %v4487_v1 = vpop.eup %4486  ;;  %v1125_v52 = vpop.xlane.xlu0 %1124  ;;  %v5792_v54 = vmul.f32 %v4485_v4, %v6126_v10 }
 0x8a4   : > { %v1306_v41 = vmul.f32 %v4487_v1, %v6127_v12  ;;  %4496 = vrcp.f32 %v1125_v52  ;;  %v1139_v62 = vpop.xlane.xlu1 %1138  ;;  %v6137_v1 = vld [vmem:[#allocation19_spill] sm:$0xff] }
 0x8a5   : > { %4498 = vrcp.f32 %v1139_v62  ;;  %3171 = vadd.xlane.f32.xlu0 %v5677_v35  ;;  %v6139_v62 = vld [vmem:[#allocation18_spill] sm:$0xff] }
 0x8a6   : > { %v4489_v21 = vpop.eup %4488  ;;  %1322 = vst.msk [vmem:[%s5773_s29 + $0x28] sm:$0xff] %vm763_vm1, %v1306_v41 }
 0x8a7   : > { %v4491_v39 = vpop.eup %4490  ;;  %v1301_v3 = vmul.f32 %v4489_v21, %v6128_v44  ;;  %v1129_v42 = vpop.xlane.xlu0 %1128 }
 0x8a8   : > { %v1308_v25 = vmul.f32 %v4491_v39, %v6129_v58  ;;  %4500 = vrcp.f32 %v1129_v42  ;;  %v1143_v8 = vpop.xlane.xlu1 %1142 }
 0x8a9   : > { %1317 = vst.msk [vmem:[%s5773_s29] sm:$0xff] %vm763_vm1, %v1301_v3  ;;  %4502 = vrcp.f32 %v1143_v8  ;;  %3167 = vadd.xlane.f32.xlu0 %v5664_v60 }
 0x8aa   : > { %v4493_v22 = vpop.eup %4492  ;;  %1324 = vst.msk [vmem:[%s5773_s29 + $0x38] sm:$0xff] %vm763_vm1, %v1308_v25 }
 0x8ab   : > { %v4495_v35 = vpop.eup %4494  ;;  %v1303_v53 = vmul.f32 %v4493_v22, %v6130_v57  ;;  %v1133_v32 = vpop.xlane.xlu0 %1132 }
 0x8ac   : > { %v1310_v13 = vmul.f32 %v4495_v35, %v6131_v34  ;;  %4504 = vrcp.f32 %v1133_v32  ;;  %v1147_v31 = vpop.xlane.xlu1 %1146 }
 0x8ad   : > { %1319 = vst.msk [vmem:[%s5773_s29 + $0x10] sm:$0xff] %vm763_vm1, %v1303_v53  ;;  %4506 = vrcp.f32 %v1147_v31  ;;  %3179 = vadd.xlane.f32.xlu0 %v5687_v45 }
 0x8ae   : > { %v4497_v36 = vpop.eup %4496  ;;  %1326 = vst.msk [vmem:[%s5773_s29 + $0x48] sm:$0xff] %vm763_vm1, %v1310_v13 }
 0x8af   : > { %v4499_v60 = vpop.eup %4498  ;;  %v1305_v27 = vmul.f32 %v4497_v36, %v6132_v48  ;;  %v1137_v2 = vpop.xlane.xlu0 %1136 }
 0x8b0   : > { %v1312_v5 = vmul.f32 %v4499_v60, %v6133_v28  ;;  %4508 = vrcp.f32 %v1137_v2 }
 0x8b1   : > { %1321 = vst.msk [vmem:[%s5773_s29 + $0x20] sm:$0xff] %vm763_vm1, %v1305_v27  ;;  %3175 = vadd.xlane.f32.xlu0 %v5675_v11 }
 0x8b2   : > { %v4501_v30 = vpop.eup %4500  ;;  %1328 = vst.msk [vmem:[%s5773_s29 + $0x58] sm:$0xff] %vm763_vm1, %v1312_v5 }
 0x8b3   : > { %v4503_v45 = vpop.eup %4502  ;;  %v1307_v29 = vmul.f32 %v4501_v30, %v6134_v50  ;;  %v1141_v18 = vpop.xlane.xlu0 %1140 }
 0x8b4   : > { %v1314_v19 = vmul.f32 %v4503_v45, %v6135_v40  ;;  %4510 = vrcp.f32 %v1141_v18 }
 0x8b5   : > { %1323 = vst.msk [vmem:[%s5773_s29 + $0x30] sm:$0xff] %vm763_vm1, %v1307_v29  ;;  %3187 = vadd.xlane.f32.xlu0 %v5699_v14  ;;  %v6138_v14 = vld [vmem:[#allocation13_spill] sm:$0xff] }
 0x8b6   : > { %v4505_v24 = vpop.eup %4504  ;;  %1330 = vst.msk [vmem:[%s5773_s29 + $0x68] sm:$0xff] %vm763_vm1, %v1314_v19 }
 0x8b7   : > { %v4507_v11 = vpop.eup %4506  ;;  %v1309_v38 = vmul.f32 %v4505_v24, %v6136_v0  ;;  %v1145_v4 = vpop.xlane.xlu0 %1144 }
 0x8b8   : > { %v1316_v52 = vmul.f32 %v4507_v11, %v6137_v1  ;;  %4512 = vrcp.f32 %v1145_v4 }
 0x8b9   : > { %1325 = vst.msk [vmem:[%s5773_s29 + $0x40] sm:$0xff] %vm763_vm1, %v1309_v38  ;;  %3183 = vadd.xlane.f32.xlu0 %v5689_v7  ;;  %v6140_v7 = vld [vmem:[#allocation17_spill] sm:$0xff] }
 0x8ba   : > { %v4509_v10 = vpop.eup %4508  ;;  %1332 = vst.msk [vmem:[%s5773_s29 + $0x78] sm:$0xff] %vm763_vm1, %v1316_v52 }
 0x8bb   : > { %v1311_v12 = vmul.f32 %v4509_v10, %v6138_v14 }
 0x8bd   : > { %1327 = vst.msk [vmem:[%s5773_s29 + $0x50] sm:$0xff] %vm763_vm1, %v1311_v12 }
 0x8be   : > { %v4511_v41 = vpop.eup %4510 }
 0x8bf   : > { %v1313_v21 = vmul.f32 %v4511_v41, %v6139_v62 }
 0x8c1   : > { %1329 = vst.msk [vmem:[%s5773_s29 + $0x60] sm:$0xff] %vm763_vm1, %v1313_v21  ;;  %v1969_v39 = vpop.permute.xlu0 %1968  ;;  %3165 = vadd.xlane.f32.xlu1 %v5657_v26 }
 0x8c2   : > { %v4513_v44 = vpop.eup %4512  ;;  %2017 = vst.msk [vmem:[%s5773_s29] sm:$0xff] %vm2016_vm3, %v1969_v39 }
 0x8c3   : > { %v1315_v3 = vmul.f32 %v4513_v44, %v6140_v7 }
 0x8c5   : > { %1331 = vst.msk [vmem:[%s5773_s29 + $0x70] sm:$0xff] %vm763_vm1, %v1315_v3  ;;  %3161 = vadd.xlane.f32.xlu1 %v5647_v46 }
 0x8c8   : > { %v1975_v42 = vpop.permute.xlu0 %1974 }
 0x8c9   : > { %2020 = vst.msk [vmem:[%s5773_s29 + $0x18] sm:$0xff] %vm2016_vm3, %v1975_v42  ;;  %3173 = vadd.xlane.f32.xlu1 %v5672_v61 }
 0x8cd   : > { %3169 = vadd.xlane.f32.xlu1 %v5659_v55 }
 0x8cf   : > { %2674 = vrot.lane.b32.xlu0 %v5727_v51, %s4564_s17 }
 0x8d0   : > { %v1979_v26 = vpop.permute.xlu0 %1978 }
 0x8d1   : > { %2022 = vst.msk [vmem:[%s5773_s29 + $0x28] sm:$0xff] %vm2016_vm3, %v1979_v26  ;;  %3181 = vadd.xlane.f32.xlu1 %v5685_v16 }
 0x8d3   : > { %2678 = vrot.lane.b32.xlu0 %v5732_v37, %s4564_s17 }
 0x8d5   : > { %3177 = vadd.xlane.f32.xlu1 %v5679_v9 }
 0x8d7   : > { %2682 = vrot.lane.b32.xlu0 %v5737_v43, %s4564_s17 }
 0x8d8   : > { %v1983_v46 = vpop.permute.xlu0 %1982 }
 0x8d9   : > { %2024 = vst.msk [vmem:[%s5773_s29 + $0x38] sm:$0xff] %vm2016_vm3, %v1983_v46  ;;  %3189 = vadd.xlane.f32.xlu1 %v5701_v63 }
 0x8db   : > { %2686 = vrot.lane.b32.xlu0 %v5742_v17, %s4564_s17 }
 0x8dd   : > { %3185 = vadd.xlane.f32.xlu1 %v5691_v47 }
 0x8df   : > { %2690 = vrot.lane.b32.xlu0 %v5750_v20, %s4564_s17 }
 0x8e0   : > { %v1987_v55 = vpop.permute.xlu0 %1986 }
 0x8e1   : > { %2026 = vst.msk [vmem:[%s5773_s29 + $0x48] sm:$0xff] %vm2016_vm3, %v1987_v55 }
 0x8e3   : > { %2694 = vrot.lane.b32.xlu0 %v5758_v6, %s4564_s17 }
 0x8e4   : > { %v1991_v61 = vpop.permute.xlu0 %1990 }
 0x8e5   : > { %2028 = vst.msk [vmem:[%s5773_s29 + $0x58] sm:$0xff] %vm2016_vm3, %v1991_v61 }
 0x8e7   : > { %2698 = vrot.lane.b32.xlu0 %v5767_v15, %s4564_s17 }
 0x8e8   : > { %v1995_v9 = vpop.permute.xlu0 %1994 }
 0x8e9   : > { %2030 = vst.msk [vmem:[%s5773_s29 + $0x68] sm:$0xff] %vm2016_vm3, %v1995_v9 }
 0x8eb   : > { %v1971_v16 = vpop.permute.xlu1 %1970 }
 0x8ec   : > { %2018 = vst.msk [vmem:[%s5773_s29 + $0x8] sm:$0xff] %vm2016_vm3, %v1971_v16  ;;  %v1999_v47 = vpop.permute.xlu0 %1998 }
 0x8ed   : > { %2032 = vst.msk [vmem:[%s5773_s29 + $0x78] sm:$0xff] %vm2016_vm3, %v1999_v47 }
 0x8ee   : > { %2676 = vrot.lane.b32.xlu1 %v5747_v33, %s4564_s17 }
 0x8ef   : > { %v1973_v63 = vpop.permute.xlu1 %1972 }
 0x8f0   : > { %2019 = vst.msk [vmem:[%s5773_s29 + $0x10] sm:$0xff] %vm2016_vm3, %v1973_v63  ;;  %v2671_v51 = vpop.permute.xlu0 %2670 }
 0x8f1   : > { %2718 = vst.msk [vmem:[%s5773_s29 + $0x8] sm:$0xff] %vm2716_vm4, %v2671_v51 }
 0x8f2   : > { %2680 = vrot.lane.b32.xlu1 %v5755_v23, %s4564_s17 }
 0x8f3   : > { %v1977_v37 = vpop.permute.xlu1 %1976 }
 0x8f4   : > { %2021 = vst.msk [vmem:[%s5773_s29 + $0x20] sm:$0xff] %vm2016_vm3, %v1977_v37 }
 0x8f6   : > { %2684 = vrot.lane.b32.xlu1 %v5763_v56, %s4564_s17 }
 0x8f7   : > { %v1981_v43 = vpop.permute.xlu1 %1980 }
 0x8f8   : > { %2023 = vst.msk [vmem:[%s5773_s29 + $0x30] sm:$0xff] %vm2016_vm3, %v1981_v43 }
 0x8fa   : > { %2688 = vrot.lane.b32.xlu1 %v5777_v49, %s4564_s17 }
 0x8fb   : > { %v1985_v17 = vpop.permute.xlu1 %1984 }
 0x8fc   : > { %2025 = vst.msk [vmem:[%s5773_s29 + $0x40] sm:$0xff] %vm2016_vm3, %v1985_v17 }
 0x8fe   : > { %2692 = vrot.lane.b32.xlu1 %v5785_v59, %s4564_s17 }
 0x8ff   : > { %v1989_v33 = vpop.permute.xlu1 %1988 }
 0x900   : > { %2027 = vst.msk [vmem:[%s5773_s29 + $0x50] sm:$0xff] %vm2016_vm3, %v1989_v33 }
 0x902   : > { %2696 = vrot.lane.b32.xlu1 %v5792_v54, %s4564_s17 }
 0x903   : > { %v1993_v20 = vpop.permute.xlu1 %1992 }
 0x904   : > { %2029 = vst.msk [vmem:[%s5773_s29 + $0x60] sm:$0xff] %vm2016_vm3, %v1993_v20 }
 0x907   : > { %v1997_v23 = vpop.permute.xlu1 %1996 }
 0x908   : > { %2031 = vst.msk [vmem:[%s5773_s29 + $0x70] sm:$0xff] %vm2016_vm3, %v1997_v23 }
 0x90b   : > { %v2669_v6 = vpop.permute.xlu1 %2668 }
 0x90c   : > { %2717 = vst.msk [vmem:[%s5773_s29] sm:$0xff] %vm2716_vm4, %v2669_v6 }
 0x90f   : > { %v2673_v56 = vpop.permute.xlu1 %2672 }
 0x910   : > { %2719 = vst.msk [vmem:[%s5773_s29 + $0x10] sm:$0xff] %vm2716_vm4, %v2673_v56 }
 0x912   : > { %v4135_v15 = vpop.f32.mrb[56].mxu0 }
 0x913   : > { %v3257_v49 = vpop.f32.mrb[57].mxu0 }
 0x914   : > { %v5914_v59 = vpop.f32.mrb[58].mxu0 }
 0x915   : > { %v5916_v58 = vpop.f32.mrb[59].mxu0 }
 0x91a   : > { %v4139_v25 = vpop.f32.mrb[60].mxu0 }
 0x91b   : > { %v3273_v54 = vpop.f32.mrb[61].mxu0 }
 0x91c   : > { %v5918_v8 = vpop.f32.mrb[62].mxu0 }
 0x91d   : > { %v5920_v22 = vpop.f32.mrb[63].mxu0 }
 0x922   : > { %v4143_v35 = vpop.f32.mrb[64].mxu0 }
 0x923   : > { %v3289_v57 = vpop.f32.mrb[65].mxu0 }
 0x924   : > { %v5922_v53 = vpop.f32.mrb[66].mxu0 }
 0x925   : > { %v5924_v32 = vpop.f32.mrb[67].mxu0 }
 0x92a   : > { %v4147_v34 = vpop.f32.mrb[68].mxu0  ;;  %v3164_v13 = vpop.xlane.xlu0 %3163 }
 0x92b   : > { %4514 = vrcp.f32 %v3164_v13  ;;  %v3305_v31 = vpop.f32.mrb[69].mxu0 }
 0x92c   : > { %v5926_v36 = vpop.f32.mrb[70].mxu0 }
 0x92d   : > { %v5928_v60 = vpop.f32.mrb[71].mxu0 }
 0x92e   : > { %v3160_v48 = vpop.xlane.xlu0 %3159 }
 0x92f   : > { %4516 = vrcp.f32 %v3160_v48 }
 0x932   : > { %v3172_v27 = vpop.xlane.xlu0 %3171 }
 0x933   : > { %4518 = vrcp.f32 %v3172_v27 }
 0x935   : > { %v4515_v2 = vpop.eup %4514 }
 0x936   : > { %v3168_v28 = vpop.xlane.xlu0 %3167  ;;  %v3338_v5 = vmul.f32 %v4515_v2, %v4135_v15 }
 0x937   : > { %4520 = vrcp.f32 %v3168_v28 }
 0x938   : > { %3372 = vrot.lane.b32.xlu1 %v3338_v5, %s4565_s28 }
 0x939   : > { %v4517_v30 = vpop.eup %4516 }
 0x93a   : > { %v3180_v45 = vpop.xlane.xlu0 %3179  ;;  %v3336_v50 = vmul.f32 %v4517_v30, %v3257_v49 }
 0x93b   : > { %4522 = vrcp.f32 %v3180_v45 }
 0x93c   : > { %3368 = vrot.lane.b32.xlu1 %v3336_v50, %s4565_s28 }
 0x93d   : > { %v4519_v29 = vpop.eup %4518 }
 0x93e   : > { %v3176_v18 = vpop.xlane.xlu0 %3175  ;;  %v3342_v40 = vmul.f32 %v4519_v29, %v4139_v25 }
 0x93f   : > { %4524 = vrcp.f32 %v3176_v18 }
 0x940   : > { %3380 = vrot.lane.b32.xlu1 %v3342_v40, %s4565_s28 }
 0x941   : > { %v4521_v19 = vpop.eup %4520 }
 0x942   : > { %v3188_v24 = vpop.xlane.xlu0 %3187  ;;  %v3340_v11 = vmul.f32 %v4521_v19, %v3273_v54 }
 0x944   : > { %3376 = vrot.lane.b32.xlu1 %v3340_v11, %s4565_s28 }
 0x945   : > { %v4523_v0 = vpop.eup %4522 }
 0x946   : > { %v3184_v38 = vpop.xlane.xlu0 %3183  ;;  %v3346_v4 = vmul.f32 %v4523_v0, %v4143_v35 }
 0x947   : > { %4526 = vrcp.f32 %v3184_v38 }
 0x948   : > { %3388 = vrot.lane.b32.xlu1 %v3346_v4, %s4565_s28  ;;  %4528 = vrcp.f32 %v3188_v24 }
 0x949   : > { %v4525_v1 = vpop.eup %4524 }
 0x94a   : > { %v2675_v52 = vpop.permute.xlu0 %2674  ;;  %v3344_v10 = vmul.f32 %v4525_v1, %v3289_v57 }
 0x94b   : > { %2720 = vst.msk [vmem:[%s5773_s29 + $0x18] sm:$0xff] %vm2716_vm4, %v2675_v52 }
 0x94c   : > { %3384 = vrot.lane.b32.xlu1 %v3344_v10, %s4565_s28 }
 0x94e   : > { %v3166_v14 = vpop.xlane.xlu1 %3165  ;;  %v2679_v12 = vpop.permute.xlu0 %2678 }
 0x94f   : > { %4530 = vrcp.f32 %v3166_v14  ;;  %2722 = vst.msk [vmem:[%s5773_s29 + $0x28] sm:$0xff] %vm2716_vm4, %v2679_v12 }
 0x951   : > { %v4527_v41 = vpop.eup %4526 }
 0x952   : > { %v3162_v62 = vpop.xlane.xlu1 %3161  ;;  %v2683_v21 = vpop.permute.xlu0 %2682  ;;  %v3348_v39 = vmul.f32 %v4527_v41, %v3305_v31 }
 0x953   : > { %v4529_v44 = vpop.eup %4528  ;;  %4532 = vrcp.f32 %v3162_v62  ;;  %2724 = vst.msk [vmem:[%s5773_s29 + $0x38] sm:$0xff] %vm2716_vm4, %v2683_v21 }
 0x954   : > { %3392 = vrot.lane.b32.xlu1 %v3348_v39, %s4565_s28  ;;  %v3350_v42 = vmul.f32 %v4529_v44, %v4147_v34 }
 0x956   : > { %v3174_v7 = vpop.xlane.xlu1 %3173  ;;  %v2687_v3 = vpop.permute.xlu0 %2686 }
 0x957   : > { %4534 = vrcp.f32 %v3174_v7  ;;  %2726 = vst.msk [vmem:[%s5773_s29 + $0x48] sm:$0xff] %vm2716_vm4, %v2687_v3 }
 0x958   : > { %3396 = vrot.lane.b32.xlu1 %v3350_v42, %s4565_s28 }
 0x959   : > { %v4531_v26 = vpop.eup %4530 }
 0x95a   : > { %v3170_v46 = vpop.xlane.xlu1 %3169  ;;  %v2691_v55 = vpop.permute.xlu0 %2690  ;;  %v3339_v61 = vmul.f32 %v4531_v26, %v5914_v59 }
 0x95b   : > { %4536 = vrcp.f32 %v3170_v46  ;;  %2728 = vst.msk [vmem:[%s5773_s29 + $0x58] sm:$0xff] %vm2716_vm4, %v2691_v55 }
 0x95c   : > { %3374 = vrot.lane.b32.xlu0 %v3339_v61, %s4565_s28 }
 0x95d   : > { %v4533_v9 = vpop.eup %4532 }
 0x95e   : > { %v3182_v16 = vpop.xlane.xlu1 %3181  ;;  %v2695_v47 = vpop.permute.xlu0 %2694  ;;  %v3337_v63 = vmul.f32 %v4533_v9, %v5916_v58 }
 0x95f   : > { %4538 = vrcp.f32 %v3182_v16  ;;  %2730 = vst.msk [vmem:[%s5773_s29 + $0x68] sm:$0xff] %vm2716_vm4, %v2695_v47 }
 0x960   : > { %3370 = vrot.lane.b32.xlu0 %v3337_v63, %s4565_s28 }
 0x961   : > { %v4535_v51 = vpop.eup %4534 }
 0x962   : > { %v3178_v37 = vpop.xlane.xlu1 %3177  ;;  %v2699_v43 = vpop.permute.xlu0 %2698  ;;  %v3343_v17 = vmul.f32 %v4535_v51, %v5918_v8 }
 0x963   : > { %4540 = vrcp.f32 %v3178_v37  ;;  %2732 = vst.msk [vmem:[%s5773_s29 + $0x78] sm:$0xff] %vm2716_vm4, %v2699_v43 }
 0x964   : > { %3382 = vrot.lane.b32.xlu0 %v3343_v17, %s4565_s28 }
 0x965   : > { %v4537_v33 = vpop.eup %4536 }
 0x966   : > { %v3190_v20 = vpop.xlane.xlu1 %3189  ;;  %v3341_v23 = vmul.f32 %v4537_v33, %v5920_v22 }
 0x968   : > { %3378 = vrot.lane.b32.xlu0 %v3341_v23, %s4565_s28 }
 0x969   : > { %v4539_v6 = vpop.eup %4538 }
 0x96a   : > { %v3186_v56 = vpop.xlane.xlu1 %3185  ;;  %v3347_v15 = vmul.f32 %v4539_v6, %v5922_v53 }
 0x96b   : > { %4542 = vrcp.f32 %v3186_v56 }
 0x96c   : > { %3390 = vrot.lane.b32.xlu0 %v3347_v15, %s4565_s28  ;;  %4544 = vrcp.f32 %v3190_v20 }
 0x96d   : > { %v4541_v49 = vpop.eup %4540 }
 0x96e   : > { %v2677_v59 = vpop.permute.xlu1 %2676  ;;  %v3345_v58 = vmul.f32 %v4541_v49, %v5924_v32 }
 0x96f   : > { %2721 = vst.msk [vmem:[%s5773_s29 + $0x20] sm:$0xff] %vm2716_vm4, %v2677_v59 }
 0x970   : > { %3386 = vrot.lane.b32.xlu0 %v3345_v58, %s4565_s28 }
 0x972   : > { %v2681_v25 = vpop.permute.xlu1 %2680 }
 0x973   : > { %2723 = vst.msk [vmem:[%s5773_s29 + $0x30] sm:$0xff] %vm2716_vm4, %v2681_v25 }
 0x975   : > { %v4543_v54 = vpop.eup %4542 }
 0x976   : > { %v2685_v8 = vpop.permute.xlu1 %2684  ;;  %v3349_v22 = vmul.f32 %v4543_v54, %v5928_v60  ;;  %v4545_v35 = vpop.eup %4544 }
 0x977   : > { %2725 = vst.msk [vmem:[%s5773_s29 + $0x40] sm:$0xff] %vm2716_vm4, %v2685_v8  ;;  %v3351_v53 = vmul.f32 %v4545_v35, %v5926_v36 }
 0x978   : > { %3394 = vrot.lane.b32.xlu0 %v3349_v22, %s4565_s28 }
 0x97a   : > { %v2689_v57 = vpop.permute.xlu1 %2688 }
 0x97b   : > { %2727 = vst.msk [vmem:[%s5773_s29 + $0x50] sm:$0xff] %vm2716_vm4, %v2689_v57 }
 0x97c   : > { %3398 = vrot.lane.b32.xlu0 %v3351_v53, %s4565_s28 }
 0x97e   : > { %v2693_v32 = vpop.permute.xlu1 %2692 }
 0x97f   : > { %2729 = vst.msk [vmem:[%s5773_s29 + $0x60] sm:$0xff] %vm2716_vm4, %v2693_v32 }
 0x982   : > { %v2697_v34 = vpop.permute.xlu1 %2696 }
 0x983   : > { %2731 = vst.msk [vmem:[%s5773_s29 + $0x70] sm:$0xff] %vm2716_vm4, %v2697_v34 }
 0x9aa   : > { %v3373_v13 = vpop.permute.xlu1 %3372 }
 0x9ab   : > { %3419 = vst.msk [vmem:[%s5773_s29 + $0x10] sm:$0xff] %vm3416_vm5, %v3373_v13 }
 0x9ae   : > { %v3369_v31 = vpop.permute.xlu1 %3368 }
 0x9af   : > { %3417 = vst.msk [vmem:[%s5773_s29] sm:$0xff] %vm3416_vm5, %v3369_v31 }
 0x9b2   : > { %v3381_v36 = vpop.permute.xlu1 %3380 }
 0x9b3   : > { %3423 = vst.msk [vmem:[%s5773_s29 + $0x30] sm:$0xff] %vm3416_vm5, %v3381_v36 }
 0x9b6   : > { %v3377_v60 = vpop.permute.xlu1 %3376 }
 0x9b7   : > { %3421 = vst.msk [vmem:[%s5773_s29 + $0x20] sm:$0xff] %vm3416_vm5, %v3377_v60 }
 0x9ba   : > { %v3389_v48 = vpop.permute.xlu1 %3388 }
 0x9bb   : > { %3427 = vst.msk [vmem:[%s5773_s29 + $0x50] sm:$0xff] %vm3416_vm5, %v3389_v48 }
 0x9be   : > { %v3385_v27 = vpop.permute.xlu1 %3384 }
 0x9bf   : > { %3425 = vst.msk [vmem:[%s5773_s29 + $0x40] sm:$0xff] %vm3416_vm5, %v3385_v27 }
 0x9c6   : > { %v3393_v2 = vpop.permute.xlu1 %3392 }
 0x9c7   : > { %3429 = vst.msk [vmem:[%s5773_s29 + $0x60] sm:$0xff] %vm3416_vm5, %v3393_v2 }
 0x9ca   : > { %v3397_v28 = vpop.permute.xlu1 %3396 }
 0x9cb   : > { %3431 = vst.msk [vmem:[%s5773_s29 + $0x70] sm:$0xff] %vm3416_vm5, %v3397_v28 }
 0x9ce   : > { %v3375_v5 = vpop.permute.xlu0 %3374 }
 0x9cf   : > { %3420 = vst.msk [vmem:[%s5773_s29 + $0x18] sm:$0xff] %vm3416_vm5, %v3375_v5 }
 0x9d2   : > { %v3371_v30 = vpop.permute.xlu0 %3370 }
 0x9d3   : > { %3418 = vst.msk [vmem:[%s5773_s29 + $0x8] sm:$0xff] %vm3416_vm5, %v3371_v30 }
 0x9d6   : > { %v3383_v45 = vpop.permute.xlu0 %3382 }
 0x9d7   : > { %3424 = vst.msk [vmem:[%s5773_s29 + $0x38] sm:$0xff] %vm3416_vm5, %v3383_v45 }
 0x9da   : > { %v3379_v50 = vpop.permute.xlu0 %3378 }
 0x9db   : > { %3422 = vst.msk [vmem:[%s5773_s29 + $0x28] sm:$0xff] %vm3416_vm5, %v3379_v50 }
 0x9de   : > { %v3391_v29 = vpop.permute.xlu0 %3390 }
 0x9df   : > { %3428 = vst.msk [vmem:[%s5773_s29 + $0x58] sm:$0xff] %vm3416_vm5, %v3391_v29 }
 0x9e2   : > { %v3387_v18 = vpop.permute.xlu0 %3386 }
 0x9e3   : > { %3426 = vst.msk [vmem:[%s5773_s29 + $0x48] sm:$0xff] %vm3416_vm5, %v3387_v18 }
 0x9ea   : > { %v3395_v40 = vpop.permute.xlu0 %3394 }
 0x9eb   : > { %3430 = vst.msk [vmem:[%s5773_s29 + $0x68] sm:$0xff] %vm3416_vm5, %v3395_v40 }
 0x9ee   : > { %v3399_v19 = vpop.permute.xlu0 %3398 }
 0x9ef   : > { %3432 = vst.msk [vmem:[%s5773_s29 + $0x78] sm:$0xff] %vm3416_vm5, %v3399_v19 }
 0x9f0 PF: > { %s18_s27 = sadd.s32 1, %s4553_s27  }
 0x9f1   : > { %p15_p4 = scmp.ge.s32.totalorder %s18_s27, 4  }
 0x9f3   :  { %17 = sbr.rel (!%p15_p4) target bundleno = 1 (0x1), region = 88 }

</bundles_post_ra>
